<compile_context>
chip_gen: v7x
topology: tpu7x:2x2x1
jax: 0.10.0
libtpu: 0.0.40
codegen_flags: <defaults>
</compile_context>

<pallas_src>
import functools

import numpy as np
import jax
import jax.numpy as jnp
from jax.experimental import pallas as pl
from jax.experimental.pallas import tpu as pltpu


# ---------------------------------------------------------------------------
# Fused kernel: (pool+conv1)+bias+lrelu and conv2+bias+lrelu for G images.
# ---------------------------------------------------------------------------
def _fused_kernel(xph_ref, a_ref, bmat_ref, b1_ref, b2_ref, o_ref, y1o_pad_ref,
                  *, G, H8, W, K1, K2, compute_dtype):
    f32 = jnp.float32
    # Row 0 of the scratch is the zero "row -1" of y1 (stage-2 top padding).
    y1o_pad_ref[0:1, :] = jnp.zeros((1, K1), compute_dtype)
    b1 = b1_ref[...]                       # (1, K1) f32
    b2 = b2_ref[...]                       # (1, K2) f32

    for g in range(G):
        xv = xph_ref[g]                    # (8, H8+1, W): 8-phase rows of padded x

        # ---- stage 1: folded 6x6 stride-4 conv as 6 row-band matmuls --------
        # even output rows (ho=2m) use padded rows 8m+ky,
        # odd  output rows (ho=2m+1) use padded rows 8m+4+ky.
        y1e = jnp.zeros((H8, K1), f32)
        y1o = jnp.zeros((H8, K1), f32)
        for ky in range(6):
            a_k = a_ref[ky]                                  # (W, K1)
            xe = xv[ky, 0:H8, :]                             # rows 8m+ky
            y1e += jnp.dot(xe, a_k, preferred_element_type=f32)
            if ky < 4:
                xo = xv[4 + ky, 0:H8, :]                     # rows 8m+4+ky
            else:
                xo = xv[ky - 4, 1:H8 + 1, :]                 # rows 8(m+1)+(ky-4)
            y1o += jnp.dot(xo, a_k, preferred_element_type=f32)
        y1e = y1e + b1
        y1o = y1o + b1
        y1e = jnp.where(y1e >= 0.0, y1e, 0.1 * y1e).astype(compute_dtype)
        y1o = jnp.where(y1o >= 0.0, y1o, 0.1 * y1o).astype(compute_dtype)

        # ---- stage 2: conv2 as 3 row-band matmuls ----------------------------
        # y1 rows needed for output row ho8: 2*ho8-1 (shifted odd), 2*ho8 (even),
        # 2*ho8+1 (odd).  Shift via a small VMEM scratch with a zero row 0.
        y1o_pad_ref[1:H8 + 1, :] = y1o
        y1o_sh = y1o_pad_ref[0:H8, :]
        acc = jnp.dot(y1o_sh, bmat_ref[0], preferred_element_type=f32)
        acc += jnp.dot(y1e, bmat_ref[1], preferred_element_type=f32)
        acc += jnp.dot(y1o, bmat_ref[2], preferred_element_type=f32)
        acc = acc + b2
        o_ref[g] = jnp.where(acc >= 0.0, acc, 0.1 * acc)     # (H8, K2) f32


def _pick_group(n_images, per_image_bytes, max_group=8, budget_bytes=2 << 20):
    """Largest divisor G of N with >=2 grid steps (v7x megacore) and small blocks."""
    best = 1
    for g in range(1, min(n_images, max_group) + 1):
        if n_images % g:
            continue
        if n_images >= 2 and n_images // g < 2:
            continue
        if g * per_image_bytes > budget_bytes:
            continue
        best = g
    return best


# ---------------------------------------------------------------------------
# FeatureEmbedding forward
# ---------------------------------------------------------------------------
def feature_embedding(x, params, *, compute_dtype=jnp.bfloat16):
    """x: (B, L, 1, H, W) float32 -> (B, L, hc1, H//8, W//8) float32."""
    B, L, C, H, W = x.shape
    assert C == 1 and H % 8 == 0 and W % 8 == 0
    N = B * L
    H8, W8, W4 = H // 8, W // 8, W // 4
    w1, b1, w2, b2 = params["w1"], params["b1"], params["w2"], params["b2"]
    hc0, hc1 = w1.shape[0], w2.shape[0]
    K1, K2 = W4 * hc0, W8 * hc1

    # ---- host prep: 8-phase row layout of x padded by 2 rows (cheap, ~1x x) --
    #   xph[n, p, i, :] = xpad[n, 8*i + p, :],  xpad = 2 zero rows + x + 6 zero rows
    x_nhw = x.reshape(N, H, W).astype(compute_dtype)
    xpad = jnp.pad(x_nhw, ((0, 0), (2, 6), (0, 0)))
    xph = xpad.reshape(N, H8 + 1, 8, W).transpose(0, 2, 1, 3)   # (N, 8, H8+1, W)

    # ---- stage-1 weights: pool folded into conv1 (6x6, stride 4), written as
    #      6 per-row Toeplitz matrices A[ky] : (W, W4*hc0); W-padding is encoded
    #      by simply dropping out-of-range taps.
    w1f = jnp.repeat(jnp.repeat(w1[:, 0], 2, axis=1), 2, axis=2) * 0.25  # (hc0,6,6)
    wi = np.arange(W)[:, None, None]
    wo = np.arange(W4)[None, :, None]
    kx = np.arange(6)[None, None, :]
    s1 = (wi == 4 * wo + kx - 2).astype(np.float32)                      # (W, W4, 6)
    A = jnp.einsum("abk,cyk->yabc", jnp.asarray(s1), w1f).reshape(6, W, K1)

    # ---- stage-2 weights: 3 per-row Toeplitz matrices B[ky] : (W4*hc0, W8*hc1)
    wi2 = np.arange(W4)[:, None, None]
    wo2 = np.arange(W8)[None, :, None]
    kx2 = np.arange(3)[None, None, :]
    s2 = (wi2 == 2 * wo2 + kx2 - 1).astype(np.float32)                   # (W4, W8, 3)
    Bm = jnp.einsum("abk,dcyk->yacbd", jnp.asarray(s2), w2).reshape(3, K1, K2)

    b1row = jnp.tile(b1.astype(jnp.float32), W4).reshape(1, K1)
    b2row = jnp.tile(b2.astype(jnp.float32), W8).reshape(1, K2)

    A = A.astype(compute_dtype)
    Bm = Bm.astype(compute_dtype)

    dsize = jnp.dtype(compute_dtype).itemsize
    G = _pick_group(N, 8 * (H8 + 1) * W * dsize)
    grid = (N // G,)

    kern = functools.partial(_fused_kernel, G=G, H8=H8, W=W, K1=K1, K2=K2,
                             compute_dtype=compute_dtype)

    out = pl.pallas_call(
        kern,
        out_shape=jax.ShapeDtypeStruct((N, H8, K2), jnp.float32),
        grid=grid,
        in_specs=[
            pl.BlockSpec((G, 8, H8 + 1, W), lambda i: (i, 0, 0, 0)),
            pl.BlockSpec((6, W, K1), lambda i: (0, 0, 0)),
            pl.BlockSpec((3, K1, K2), lambda i: (0, 0, 0)),
            pl.BlockSpec((1, K1), lambda i: (0, 0)),
            pl.BlockSpec((1, K2), lambda i: (0, 0)),
        ],
        out_specs=pl.BlockSpec((G, H8, K2), lambda i: (i, 0, 0)),
        scratch_shapes=[pltpu.VMEM((H8 + 1, K1), compute_dtype)],
        compiler_params=pltpu.CompilerParams(
            dimension_semantics=("parallel",),
            vmem_limit_bytes=48 * 1024 * 1024),
    )(xph, A, Bm, b1row, b2row)

    # (N, H8, W8*hc1) with lane order (wo, c) -> (B, L, hc1, H8, W8).
    # The transpose only touches the (small) output, not the input-sized data.
    out = out.reshape(N, H8, W8, hc1).transpose(0, 3, 1, 2)
    return out.reshape(B, L, hc1, H8, W8)


# ---------------------------------------------------------------------------
# Pure-JAX reference (mirrors the PyTorch module) + params
# ---------------------------------------------------------------------------
def feature_embedding_reference(x, params):
    B, L, C, H, W = x.shape
    xr = x.reshape(B * L, C, H, W)
    # bilinear 0.5x with align_corners=False on even H/W == 2x2 average pool
    x2 = xr.reshape(B * L, C, H // 2, 2, W // 2, 2).mean(axis=(3, 5))

    def conv_lrelu(z, w, b):
        y = jax.lax.conv_general_dilated(
            z, w, window_strides=(2, 2), padding=((1, 1), (1, 1)),
            dimension_numbers=("NCHW", "OIHW", "NCHW"))
        y = y + b.reshape(1, -1, 1, 1)
        return jnp.where(y >= 0, y, 0.1 * y)

    y1 = conv_lrelu(x2, params["w1"], params["b1"])
    y2 = conv_lrelu(y1, params["w2"], params["b2"])
    return y2.reshape(B, L, -1, H // 8, W // 8)


def init_params(key, hidden_channels):
    hc0, hc1 = hidden_channels
    k1, k2, k3, k4 = jax.random.split(key, 4)
    return {
        "w1": jax.random.normal(k1, (hc0, 1, 3, 3), jnp.float32) * 0.1,
        "b1": jax.random.normal(k2, (hc0,), jnp.float32) * 0.1,
        "w2": jax.random.normal(k3, (hc1, hc0, 3, 3), jnp.float32) * 0.1,
        "b2": jax.random.normal(k4, (hc1,), jnp.float32) * 0.1,
    }


if __name__ == "__main__":
    key = jax.random.PRNGKey(0)
    kx_, kp = jax.random.split(key)

    B, L, H, W = 2, 4, 16, 16
    hidden_channels = [8, 16]

    x = jax.random.normal(kx_, (B, L, 1, H, W), jnp.float32)
    params = init_params(kp, hidden_channels)

    fe = jax.jit(feature_embedding)
    out = jax.block_until_ready(fe(x, params))
    assert out.shape == (B, L, hidden_channels[1], H // 8, W // 8), out.shape

    ref = jax.block_until_ready(feature_embedding_reference(x, params))
    err = float(jnp.max(jnp.abs(out - ref)))
    assert err < 5e-2, f"max abs error vs reference: {err}"

    print("KERNEL_OK")
</pallas_src>

<mosaic_0001>
module attributes {stable_mosaic.version = 11 : i64} {
  func.func @_fused_kernel(%arg0: i32, %arg1: memref<4x8x3x16xbf16, #tpu.memory_space<vmem>>, %arg2: memref<6x16x32xbf16, #tpu.memory_space<vmem>>, %arg3: memref<3x32x32xbf16, #tpu.memory_space<vmem>>, %arg4: memref<1x32xf32, #tpu.memory_space<vmem>>, %arg5: memref<1x32xf32, #tpu.memory_space<vmem>>, %arg6: memref<4x2x32xf32, #tpu.memory_space<vmem>>, %arg7: memref<3x32xbf16, #tpu.memory_space<vmem>>) attributes {dimension_semantics = [#tpu.dimension_semantics<parallel>], iteration_bounds = array<i64: 2>, scalar_prefetch = 0 : i64, scratch_operands = 1 : i64, tpu.core_type = #tpu.core_type<tc>, window_params = [{transform_indices = @transform_0, window_bounds = array<i64: 4, 8, 3, 16>}, {pipeline_mode = #tpu.pipeline_mode<synchronous>, transform_indices = @transform_1, window_bounds = array<i64: 6, 16, 32>}, {pipeline_mode = #tpu.pipeline_mode<synchronous>, transform_indices = @transform_2, window_bounds = array<i64: 3, 32, 32>}, {pipeline_mode = #tpu.pipeline_mode<synchronous>, transform_indices = @transform_3, window_bounds = array<i64: 1, 32>}, {pipeline_mode = #tpu.pipeline_mode<synchronous>, transform_indices = @transform_4, window_bounds = array<i64: 1, 32>}, {transform_indices = @transform_5, window_bounds = array<i64: 4, 2, 32>}]} {
    %cst = arith.constant 0.000000e+00 : bf16
    %0 = vector.broadcast %cst : bf16 to vector<1x32xbf16>
    %c0 = arith.constant 0 : index
    %c0_0 = arith.constant 0 : index
    %1 = vector.load %arg7[%c0, %c0_0] : memref<3x32xbf16, #tpu.memory_space<vmem>>, vector<1x32xbf16>
    tpu.vector_store %arg7[%c0, %c0_0], %0 {strides = array<i32>} : memref<3x32xbf16, #tpu.memory_space<vmem>>, vector<1x32xbf16>,
    %c0_1 = arith.constant 0 : index
    %c0_2 = arith.constant 0 : index
    %2 = vector.load %arg4[%c0_1, %c0_2] : memref<1x32xf32, #tpu.memory_space<vmem>>, vector<1x32xf32>
    %c0_3 = arith.constant 0 : index
    %c0_4 = arith.constant 0 : index
    %3 = vector.load %arg5[%c0_3, %c0_4] : memref<1x32xf32, #tpu.memory_space<vmem>>, vector<1x32xf32>
    %c0_5 = arith.constant 0 : index
    %c0_6 = arith.constant 0 : index
    %c0_7 = arith.constant 0 : index
    %c0_8 = arith.constant 0 : index
    %4 = vector.load %arg1[%c0_5, %c0_6, %c0_7, %c0_8] : memref<4x8x3x16xbf16, #tpu.memory_space<vmem>>, vector<1x8x3x16xbf16>
    %5 = vector.shape_cast %4 : vector<1x8x3x16xbf16> to vector<8x3x16xbf16>
    %cst_9 = arith.constant 0.000000e+00 : f32
    %6 = vector.broadcast %cst_9 : f32 to vector<2x32xf32>
    %cst_10 = arith.constant 0.000000e+00 : f32
    %7 = vector.broadcast %cst_10 : f32 to vector<2x32xf32>
    %c0_11 = arith.constant 0 : index
    %c0_12 = arith.constant 0 : index
    %c0_13 = arith.constant 0 : index
    %8 = vector.load %arg2[%c0_11, %c0_12, %c0_13] : memref<6x16x32xbf16, #tpu.memory_space<vmem>>, vector<1x16x32xbf16>
    %9 = vector.shape_cast %8 : vector<1x16x32xbf16> to vector<16x32xbf16>
    %10 = vector.extract_strided_slice %5 {offsets = [0, 0, 0], sizes = [1, 2, 16], strides = [1, 1, 1]} : vector<8x3x16xbf16> to vector<1x2x16xbf16>
    %11 = vector.shape_cast %10 : vector<1x2x16xbf16> to vector<2x16xbf16>
    %cst_14 = arith.constant dense<0.000000e+00> : vector<2x32xf32>
    %12 = tpu.matmul %11, %9, %cst_14 {dimension_numbers = #tpu.dot_dimension_numbers<[1], [0], [0], [1], [0, 0, 1, 1], [], []>} : vector<2x16xbf16>, vector<16x32xbf16>, vector<2x32xf32> -> vector<2x32xf32>
    %13 = arith.addf %6, %12 : vector<2x32xf32>
    %14 = vector.extract_strided_slice %5 {offsets = [4, 0, 0], sizes = [1, 2, 16], strides = [1, 1, 1]} : vector<8x3x16xbf16> to vector<1x2x16xbf16>
    %15 = vector.shape_cast %14 : vector<1x2x16xbf16> to vector<2x16xbf16>
    %cst_15 = arith.constant dense<0.000000e+00> : vector<2x32xf32>
    %16 = tpu.matmul %15, %9, %cst_15 {dimension_numbers = #tpu.dot_dimension_numbers<[1], [0], [0], [1], [0, 0, 1, 1], [], []>} : vector<2x16xbf16>, vector<16x32xbf16>, vector<2x32xf32> -> vector<2x32xf32>
    %17 = arith.addf %7, %16 : vector<2x32xf32>
    %c1 = arith.constant 1 : index
    %c0_16 = arith.constant 0 : index
    %c0_17 = arith.constant 0 : index
    %18 = vector.load %arg2[%c1, %c0_16, %c0_17] : memref<6x16x32xbf16, #tpu.memory_space<vmem>>, vector<1x16x32xbf16>
    %19 = vector.shape_cast %18 : vector<1x16x32xbf16> to vector<16x32xbf16>
    %20 = vector.extract_strided_slice %5 {offsets = [1, 0, 0], sizes = [1, 2, 16], strides = [1, 1, 1]} : vector<8x3x16xbf16> to vector<1x2x16xbf16>
    %21 = vector.shape_cast %20 : vector<1x2x16xbf16> to vector<2x16xbf16>
    %cst_18 = arith.constant dense<0.000000e+00> : vector<2x32xf32>
    %22 = tpu.matmul %21, %19, %cst_18 {dimension_numbers = #tpu.dot_dimension_numbers<[1], [0], [0], [1], [0, 0, 1, 1], [], []>} : vector<2x16xbf16>, vector<16x32xbf16>, vector<2x32xf32> -> vector<2x32xf32>
    %23 = arith.addf %13, %22 : vector<2x32xf32>
    %24 = vector.extract_strided_slice %5 {offsets = [5, 0, 0], sizes = [1, 2, 16], strides = [1, 1, 1]} : vector<8x3x16xbf16> to vector<1x2x16xbf16>
    %25 = vector.shape_cast %24 : vector<1x2x16xbf16> to vector<2x16xbf16>
    %cst_19 = arith.constant dense<0.000000e+00> : vector<2x32xf32>
    %26 = tpu.matmul %25, %19, %cst_19 {dimension_numbers = #tpu.dot_dimension_numbers<[1], [0], [0], [1], [0, 0, 1, 1], [], []>} : vector<2x16xbf16>, vector<16x32xbf16>, vector<2x32xf32> -> vector<2x32xf32>
    %27 = arith.addf %17, %26 : vector<2x32xf32>
    %c2 = arith.constant 2 : index
    %c0_20 = arith.constant 0 : index
    %c0_21 = arith.constant 0 : index
    %28 = vector.load %arg2[%c2, %c0_20, %c0_21] : memref<6x16x32xbf16, #tpu.memory_space<vmem>>, vector<1x16x32xbf16>
    %29 = vector.shape_cast %28 : vector<1x16x32xbf16> to vector<16x32xbf16>
    %30 = vector.extract_strided_slice %5 {offsets = [2, 0, 0], sizes = [1, 2, 16], strides = [1, 1, 1]} : vector<8x3x16xbf16> to vector<1x2x16xbf16>
    %31 = vector.shape_cast %30 : vector<1x2x16xbf16> to vector<2x16xbf16>
    %cst_22 = arith.constant dense<0.000000e+00> : vector<2x32xf32>
    %32 = tpu.matmul %31, %29, %cst_22 {dimension_numbers = #tpu.dot_dimension_numbers<[1], [0], [0], [1], [0, 0, 1, 1], [], []>} : vector<2x16xbf16>, vector<16x32xbf16>, vector<2x32xf32> -> vector<2x32xf32>
    %33 = arith.addf %23, %32 : vector<2x32xf32>
    %34 = vector.extract_strided_slice %5 {offsets = [6, 0, 0], sizes = [1, 2, 16], strides = [1, 1, 1]} : vector<8x3x16xbf16> to vector<1x2x16xbf16>
    %35 = vector.shape_cast %34 : vector<1x2x16xbf16> to vector<2x16xbf16>
    %cst_23 = arith.constant dense<0.000000e+00> : vector<2x32xf32>
    %36 = tpu.matmul %35, %29, %cst_23 {dimension_numbers = #tpu.dot_dimension_numbers<[1], [0], [0], [1], [0, 0, 1, 1], [], []>} : vector<2x16xbf16>, vector<16x32xbf16>, vector<2x32xf32> -> vector<2x32xf32>
    %37 = arith.addf %27, %36 : vector<2x32xf32>
    %c3 = arith.constant 3 : index
    %c0_24 = arith.constant 0 : index
    %c0_25 = arith.constant 0 : index
    %38 = vector.load %arg2[%c3, %c0_24, %c0_25] : memref<6x16x32xbf16, #tpu.memory_space<vmem>>, vector<1x16x32xbf16>
    %39 = vector.shape_cast %38 : vector<1x16x32xbf16> to vector<16x32xbf16>
    %40 = vector.extract_strided_slice %5 {offsets = [3, 0, 0], sizes = [1, 2, 16], strides = [1, 1, 1]} : vector<8x3x16xbf16> to vector<1x2x16xbf16>
    %41 = vector.shape_cast %40 : vector<1x2x16xbf16> to vector<2x16xbf16>
    %cst_26 = arith.constant dense<0.000000e+00> : vector<2x32xf32>
    %42 = tpu.matmul %41, %39, %cst_26 {dimension_numbers = #tpu.dot_dimension_numbers<[1], [0], [0], [1], [0, 0, 1, 1], [], []>} : vector<2x16xbf16>, vector<16x32xbf16>, vector<2x32xf32> -> vector<2x32xf32>
    %43 = arith.addf %33, %42 : vector<2x32xf32>
    %44 = vector.extract_strided_slice %5 {offsets = [7, 0, 0], sizes = [1, 2, 16], strides = [1, 1, 1]} : vector<8x3x16xbf16> to vector<1x2x16xbf16>
    %45 = vector.shape_cast %44 : vector<1x2x16xbf16> to vector<2x16xbf16>
    %cst_27 = arith.constant dense<0.000000e+00> : vector<2x32xf32>
    %46 = tpu.matmul %45, %39, %cst_27 {dimension_numbers = #tpu.dot_dimension_numbers<[1], [0], [0], [1], [0, 0, 1, 1], [], []>} : vector<2x16xbf16>, vector<16x32xbf16>, vector<2x32xf32> -> vector<2x32xf32>
    %47 = arith.addf %37, %46 : vector<2x32xf32>
    %c4 = arith.constant 4 : index
    %c0_28 = arith.constant 0 : index
    %c0_29 = arith.constant 0 : index
    %48 = vector.load %arg2[%c4, %c0_28, %c0_29] : memref<6x16x32xbf16, #tpu.memory_space<vmem>>, vector<1x16x32xbf16>
    %49 = vector.shape_cast %48 : vector<1x16x32xbf16> to vector<16x32xbf16>
    %50 = vector.extract_strided_slice %5 {offsets = [4, 0, 0], sizes = [1, 2, 16], strides = [1, 1, 1]} : vector<8x3x16xbf16> to vector<1x2x16xbf16>
    %51 = vector.shape_cast %50 : vector<1x2x16xbf16> to vector<2x16xbf16>
    %cst_30 = arith.constant dense<0.000000e+00> : vector<2x32xf32>
    %52 = tpu.matmul %51, %49, %cst_30 {dimension_numbers = #tpu.dot_dimension_numbers<[1], [0], [0], [1], [0, 0, 1, 1], [], []>} : vector<2x16xbf16>, vector<16x32xbf16>, vector<2x32xf32> -> vector<2x32xf32>
    %53 = arith.addf %43, %52 : vector<2x32xf32>
    %54 = vector.extract_strided_slice %5 {offsets = [0, 1, 0], sizes = [1, 2, 16], strides = [1, 1, 1]} : vector<8x3x16xbf16> to vector<1x2x16xbf16>
    %55 = vector.shape_cast %54 : vector<1x2x16xbf16> to vector<2x16xbf16>
    %cst_31 = arith.constant dense<0.000000e+00> : vector<2x32xf32>
    %56 = tpu.matmul %55, %49, %cst_31 {dimension_numbers = #tpu.dot_dimension_numbers<[1], [0], [0], [1], [0, 0, 1, 1], [], []>} : vector<2x16xbf16>, vector<16x32xbf16>, vector<2x32xf32> -> vector<2x32xf32>
    %57 = arith.addf %47, %56 : vector<2x32xf32>
    %c5 = arith.constant 5 : index
    %c0_32 = arith.constant 0 : index
    %c0_33 = arith.constant 0 : index
    %58 = vector.load %arg2[%c5, %c0_32, %c0_33] : memref<6x16x32xbf16, #tpu.memory_space<vmem>>, vector<1x16x32xbf16>
    %59 = vector.shape_cast %58 : vector<1x16x32xbf16> to vector<16x32xbf16>
    %60 = vector.extract_strided_slice %5 {offsets = [5, 0, 0], sizes = [1, 2, 16], strides = [1, 1, 1]} : vector<8x3x16xbf16> to vector<1x2x16xbf16>
    %61 = vector.shape_cast %60 : vector<1x2x16xbf16> to vector<2x16xbf16>
    %cst_34 = arith.constant dense<0.000000e+00> : vector<2x32xf32>
    %62 = tpu.matmul %61, %59, %cst_34 {dimension_numbers = #tpu.dot_dimension_numbers<[1], [0], [0], [1], [0, 0, 1, 1], [], []>} : vector<2x16xbf16>, vector<16x32xbf16>, vector<2x32xf32> -> vector<2x32xf32>
    %63 = arith.addf %53, %62 : vector<2x32xf32>
    %64 = vector.extract_strided_slice %5 {offsets = [1, 1, 0], sizes = [1, 2, 16], strides = [1, 1, 1]} : vector<8x3x16xbf16> to vector<1x2x16xbf16>
    %65 = vector.shape_cast %64 : vector<1x2x16xbf16> to vector<2x16xbf16>
    %cst_35 = arith.constant dense<0.000000e+00> : vector<2x32xf32>
    %66 = tpu.matmul %65, %59, %cst_35 {dimension_numbers = #tpu.dot_dimension_numbers<[1], [0], [0], [1], [0, 0, 1, 1], [], []>} : vector<2x16xbf16>, vector<16x32xbf16>, vector<2x32xf32> -> vector<2x32xf32>
    %67 = arith.addf %57, %66 : vector<2x32xf32>
    %68 = vector.broadcast %2 : vector<1x32xf32> to vector<2x32xf32>
    %69 = arith.addf %63, %68 : vector<2x32xf32>
    %70 = vector.broadcast %2 : vector<1x32xf32> to vector<2x32xf32>
    %71 = arith.addf %67, %70 : vector<2x32xf32>
    %cst_36 = arith.constant 0.000000e+00 : f32
    %72 = vector.broadcast %cst_36 : f32 to vector<2x32xf32>
    %73 = arith.cmpf oge, %69, %72 : vector<2x32xf32>
    %cst_37 = arith.constant 1.000000e-01 : f32
    %74 = vector.broadcast %cst_37 : f32 to vector<2x32xf32>
    %75 = arith.mulf %74, %69 : vector<2x32xf32>
    %76 = arith.select %73, %69, %75 : vector<2x32xi1>, vector<2x32xf32>
    %77 = arith.truncf %76 : vector<2x32xf32> to vector<2x32xbf16>
    %cst_38 = arith.constant 0.000000e+00 : f32
    %78 = vector.broadcast %cst_38 : f32 to vector<2x32xf32>
    %79 = arith.cmpf oge, %71, %78 : vector<2x32xf32>
    %cst_39 = arith.constant 1.000000e-01 : f32
    %80 = vector.broadcast %cst_39 : f32 to vector<2x32xf32>
    %81 = arith.mulf %80, %71 : vector<2x32xf32>
    %82 = arith.select %79, %71, %81 : vector<2x32xi1>, vector<2x32xf32>
    %83 = arith.truncf %82 : vector<2x32xf32> to vector<2x32xbf16>
    %c1_40 = arith.constant 1 : index
    %c0_41 = arith.constant 0 : index
    %84 = vector.load %arg7[%c1_40, %c0_41] : memref<3x32xbf16, #tpu.memory_space<vmem>>, vector<2x32xbf16>
    tpu.vector_store %arg7[%c1_40, %c0_41], %83 {strides = array<i32>} : memref<3x32xbf16, #tpu.memory_space<vmem>>, vector<2x32xbf16>,
    %c0_42 = arith.constant 0 : index
    %c0_43 = arith.constant 0 : index
    %85 = vector.load %arg7[%c0_42, %c0_43] : memref<3x32xbf16, #tpu.memory_space<vmem>>, vector<2x32xbf16>
    %c0_44 = arith.constant 0 : index
    %c0_45 = arith.constant 0 : index
    %c0_46 = arith.constant 0 : index
    %86 = vector.load %arg3[%c0_44, %c0_45, %c0_46] : memref<3x32x32xbf16, #tpu.memory_space<vmem>>, vector<1x32x32xbf16>
    %87 = vector.shape_cast %86 : vector<1x32x32xbf16> to vector<32x32xbf16>
    %cst_47 = arith.constant dense<0.000000e+00> : vector<2x32xf32>
    %88 = tpu.matmul %85, %87, %cst_47 {dimension_numbers = #tpu.dot_dimension_numbers<[1], [0], [0], [1], [0, 0, 1, 1], [], []>} : vector<2x32xbf16>, vector<32x32xbf16>, vector<2x32xf32> -> vector<2x32xf32>
    %c1_48 = arith.constant 1 : index
    %c0_49 = arith.constant 0 : index
    %c0_50 = arith.constant 0 : index
    %89 = vector.load %arg3[%c1_48, %c0_49, %c0_50] : memref<3x32x32xbf16, #tpu.memory_space<vmem>>, vector<1x32x32xbf16>
    %90 = vector.shape_cast %89 : vector<1x32x32xbf16> to vector<32x32xbf16>
    %cst_51 = arith.constant dense<0.000000e+00> : vector<2x32xf32>
    %91 = tpu.matmul %77, %90, %cst_51 {dimension_numbers = #tpu.dot_dimension_numbers<[1], [0], [0], [1], [0, 0, 1, 1], [], []>} : vector<2x32xbf16>, vector<32x32xbf16>, vector<2x32xf32> -> vector<2x32xf32>
    %92 = arith.addf %88, %91 : vector<2x32xf32>
    %c2_52 = arith.constant 2 : index
    %c0_53 = arith.constant 0 : index
    %c0_54 = arith.constant 0 : index
    %93 = vector.load %arg3[%c2_52, %c0_53, %c0_54] : memref<3x32x32xbf16, #tpu.memory_space<vmem>>, vector<1x32x32xbf16>
    %94 = vector.shape_cast %93 : vector<1x32x32xbf16> to vector<32x32xbf16>
    %cst_55 = arith.constant dense<0.000000e+00> : vector<2x32xf32>
    %95 = tpu.matmul %83, %94, %cst_55 {dimension_numbers = #tpu.dot_dimension_numbers<[1], [0], [0], [1], [0, 0, 1, 1], [], []>} : vector<2x32xbf16>, vector<32x32xbf16>, vector<2x32xf32> -> vector<2x32xf32>
    %96 = arith.addf %92, %95 : vector<2x32xf32>
    %97 = vector.broadcast %3 : vector<1x32xf32> to vector<2x32xf32>
    %98 = arith.addf %96, %97 : vector<2x32xf32>
    %cst_56 = arith.constant 0.000000e+00 : f32
    %99 = vector.broadcast %cst_56 : f32 to vector<2x32xf32>
    %100 = arith.cmpf oge, %98, %99 : vector<2x32xf32>
    %cst_57 = arith.constant 1.000000e-01 : f32
    %101 = vector.broadcast %cst_57 : f32 to vector<2x32xf32>
    %102 = arith.mulf %101, %98 : vector<2x32xf32>
    %103 = arith.select %100, %98, %102 : vector<2x32xi1>, vector<2x32xf32>
    %c0_58 = arith.constant 0 : index
    %c0_59 = arith.constant 0 : index
    %c0_60 = arith.constant 0 : index
    %104 = vector.load %arg6[%c0_58, %c0_59, %c0_60] : memref<4x2x32xf32, #tpu.memory_space<vmem>>, vector<1x2x32xf32>
    %105 = vector.shape_cast %104 : vector<1x2x32xf32> to vector<2x32xf32>
    %106 = vector.shape_cast %103 : vector<2x32xf32> to vector<1x2x32xf32>
    tpu.vector_store %arg6[%c0_58, %c0_59, %c0_60], %106 {strides = array<i32>} : memref<4x2x32xf32, #tpu.memory_space<vmem>>, vector<1x2x32xf32>,
    %c1_61 = arith.constant 1 : index
    %c0_62 = arith.constant 0 : index
    %c0_63 = arith.constant 0 : index
    %c0_64 = arith.constant 0 : index
    %107 = vector.load %arg1[%c1_61, %c0_62, %c0_63, %c0_64] : memref<4x8x3x16xbf16, #tpu.memory_space<vmem>>, vector<1x8x3x16xbf16>
    %108 = vector.shape_cast %107 : vector<1x8x3x16xbf16> to vector<8x3x16xbf16>
    %cst_65 = arith.constant 0.000000e+00 : f32
    %109 = vector.broadcast %cst_65 : f32 to vector<2x32xf32>
    %cst_66 = arith.constant 0.000000e+00 : f32
    %110 = vector.broadcast %cst_66 : f32 to vector<2x32xf32>
    %c0_67 = arith.constant 0 : index
    %c0_68 = arith.constant 0 : index
    %c0_69 = arith.constant 0 : index
    %111 = vector.load %arg2[%c0_67, %c0_68, %c0_69] : memref<6x16x32xbf16, #tpu.memory_space<vmem>>, vector<1x16x32xbf16>
    %112 = vector.shape_cast %111 : vector<1x16x32xbf16> to vector<16x32xbf16>
    %113 = vector.extract_strided_slice %108 {offsets = [0, 0, 0], sizes = [1, 2, 16], strides = [1, 1, 1]} : vector<8x3x16xbf16> to vector<1x2x16xbf16>
    %114 = vector.shape_cast %113 : vector<1x2x16xbf16> to vector<2x16xbf16>
    %cst_70 = arith.constant dense<0.000000e+00> : vector<2x32xf32>
    %115 = tpu.matmul %114, %112, %cst_70 {dimension_numbers = #tpu.dot_dimension_numbers<[1], [0], [0], [1], [0, 0, 1, 1], [], []>} : vector<2x16xbf16>, vector<16x32xbf16>, vector<2x32xf32> -> vector<2x32xf32>
    %116 = arith.addf %109, %115 : vector<2x32xf32>
    %117 = vector.extract_strided_slice %108 {offsets = [4, 0, 0], sizes = [1, 2, 16], strides = [1, 1, 1]} : vector<8x3x16xbf16> to vector<1x2x16xbf16>
    %118 = vector.shape_cast %117 : vector<1x2x16xbf16> to vector<2x16xbf16>
    %cst_71 = arith.constant dense<0.000000e+00> : vector<2x32xf32>
    %119 = tpu.matmul %118, %112, %cst_71 {dimension_numbers = #tpu.dot_dimension_numbers<[1], [0], [0], [1], [0, 0, 1, 1], [], []>} : vector<2x16xbf16>, vector<16x32xbf16>, vector<2x32xf32> -> vector<2x32xf32>
    %120 = arith.addf %110, %119 : vector<2x32xf32>
    %c1_72 = arith.constant 1 : index
    %c0_73 = arith.constant 0 : index
    %c0_74 = arith.constant 0 : index
    %121 = vector.load %arg2[%c1_72, %c0_73, %c0_74] : memref<6x16x32xbf16, #tpu.memory_space<vmem>>, vector<1x16x32xbf16>
    %122 = vector.shape_cast %121 : vector<1x16x32xbf16> to vector<16x32xbf16>
    %123 = vector.extract_strided_slice %108 {offsets = [1, 0, 0], sizes = [1, 2, 16], strides = [1, 1, 1]} : vector<8x3x16xbf16> to vector<1x2x16xbf16>
    %124 = vector.shape_cast %123 : vector<1x2x16xbf16> to vector<2x16xbf16>
    %cst_75 = arith.constant dense<0.000000e+00> : vector<2x32xf32>
    %125 = tpu.matmul %124, %122, %cst_75 {dimension_numbers = #tpu.dot_dimension_numbers<[1], [0], [0], [1], [0, 0, 1, 1], [], []>} : vector<2x16xbf16>, vector<16x32xbf16>, vector<2x32xf32> -> vector<2x32xf32>
    %126 = arith.addf %116, %125 : vector<2x32xf32>
    %127 = vector.extract_strided_slice %108 {offsets = [5, 0, 0], sizes = [1, 2, 16], strides = [1, 1, 1]} : vector<8x3x16xbf16> to vector<1x2x16xbf16>
    %128 = vector.shape_cast %127 : vector<1x2x16xbf16> to vector<2x16xbf16>
    %cst_76 = arith.constant dense<0.000000e+00> : vector<2x32xf32>
    %129 = tpu.matmul %128, %122, %cst_76 {dimension_numbers = #tpu.dot_dimension_numbers<[1], [0], [0], [1], [0, 0, 1, 1], [], []>} : vector<2x16xbf16>, vector<16x32xbf16>, vector<2x32xf32> -> vector<2x32xf32>
    %130 = arith.addf %120, %129 : vector<2x32xf32>
    %c2_77 = arith.constant 2 : index
    %c0_78 = arith.constant 0 : index
    %c0_79 = arith.constant 0 : index
    %131 = vector.load %arg2[%c2_77, %c0_78, %c0_79] : memref<6x16x32xbf16, #tpu.memory_space<vmem>>, vector<1x16x32xbf16>
    %132 = vector.shape_cast %131 : vector<1x16x32xbf16> to vector<16x32xbf16>
    %133 = vector.extract_strided_slice %108 {offsets = [2, 0, 0], sizes = [1, 2, 16], strides = [1, 1, 1]} : vector<8x3x16xbf16> to vector<1x2x16xbf16>
    %134 = vector.shape_cast %133 : vector<1x2x16xbf16> to vector<2x16xbf16>
    %cst_80 = arith.constant dense<0.000000e+00> : vector<2x32xf32>
    %135 = tpu.matmul %134, %132, %cst_80 {dimension_numbers = #tpu.dot_dimension_numbers<[1], [0], [0], [1], [0, 0, 1, 1], [], []>} : vector<2x16xbf16>, vector<16x32xbf16>, vector<2x32xf32> -> vector<2x32xf32>
    %136 = arith.addf %126, %135 : vector<2x32xf32>
    %137 = vector.extract_strided_slice %108 {offsets = [6, 0, 0], sizes = [1, 2, 16], strides = [1, 1, 1]} : vector<8x3x16xbf16> to vector<1x2x16xbf16>
    %138 = vector.shape_cast %137 : vector<1x2x16xbf16> to vector<2x16xbf16>
    %cst_81 = arith.constant dense<0.000000e+00> : vector<2x32xf32>
    %139 = tpu.matmul %138, %132, %cst_81 {dimension_numbers = #tpu.dot_dimension_numbers<[1], [0], [0], [1], [0, 0, 1, 1], [], []>} : vector<2x16xbf16>, vector<16x32xbf16>, vector<2x32xf32> -> vector<2x32xf32>
    %140 = arith.addf %130, %139 : vector<2x32xf32>
    %c3_82 = arith.constant 3 : index
    %c0_83 = arith.constant 0 : index
    %c0_84 = arith.constant 0 : index
    %141 = vector.load %arg2[%c3_82, %c0_83, %c0_84] : memref<6x16x32xbf16, #tpu.memory_space<vmem>>, vector<1x16x32xbf16>
    %142 = vector.shape_cast %141 : vector<1x16x32xbf16> to vector<16x32xbf16>
    %143 = vector.extract_strided_slice %108 {offsets = [3, 0, 0], sizes = [1, 2, 16], strides = [1, 1, 1]} : vector<8x3x16xbf16> to vector<1x2x16xbf16>
    %144 = vector.shape_cast %143 : vector<1x2x16xbf16> to vector<2x16xbf16>
    %cst_85 = arith.constant dense<0.000000e+00> : vector<2x32xf32>
    %145 = tpu.matmul %144, %142, %cst_85 {dimension_numbers = #tpu.dot_dimension_numbers<[1], [0], [0], [1], [0, 0, 1, 1], [], []>} : vector<2x16xbf16>, vector<16x32xbf16>, vector<2x32xf32> -> vector<2x32xf32>
    %146 = arith.addf %136, %145 : vector<2x32xf32>
    %147 = vector.extract_strided_slice %108 {offsets = [7, 0, 0], sizes = [1, 2, 16], strides = [1, 1, 1]} : vector<8x3x16xbf16> to vector<1x2x16xbf16>
    %148 = vector.shape_cast %147 : vector<1x2x16xbf16> to vector<2x16xbf16>
    %cst_86 = arith.constant dense<0.000000e+00> : vector<2x32xf32>
    %149 = tpu.matmul %148, %142, %cst_86 {dimension_numbers = #tpu.dot_dimension_numbers<[1], [0], [0], [1], [0, 0, 1, 1], [], []>} : vector<2x16xbf16>, vector<16x32xbf16>, vector<2x32xf32> -> vector<2x32xf32>
    %150 = arith.addf %140, %149 : vector<2x32xf32>
    %c4_87 = arith.constant 4 : index
    %c0_88 = arith.constant 0 : index
    %c0_89 = arith.constant 0 : index
    %151 = vector.load %arg2[%c4_87, %c0_88, %c0_89] : memref<6x16x32xbf16, #tpu.memory_space<vmem>>, vector<1x16x32xbf16>
    %152 = vector.shape_cast %151 : vector<1x16x32xbf16> to vector<16x32xbf16>
    %153 = vector.extract_strided_slice %108 {offsets = [4, 0, 0], sizes = [1, 2, 16], strides = [1, 1, 1]} : vector<8x3x16xbf16> to vector<1x2x16xbf16>
    %154 = vector.shape_cast %153 : vector<1x2x16xbf16> to vector<2x16xbf16>
    %cst_90 = arith.constant dense<0.000000e+00> : vector<2x32xf32>
    %155 = tpu.matmul %154, %152, %cst_90 {dimension_numbers = #tpu.dot_dimension_numbers<[1], [0], [0], [1], [0, 0, 1, 1], [], []>} : vector<2x16xbf16>, vector<16x32xbf16>, vector<2x32xf32> -> vector<2x32xf32>
    %156 = arith.addf %146, %155 : vector<2x32xf32>
    %157 = vector.extract_strided_slice %108 {offsets = [0, 1, 0], sizes = [1, 2, 16], strides = [1, 1, 1]} : vector<8x3x16xbf16> to vector<1x2x16xbf16>
    %158 = vector.shape_cast %157 : vector<1x2x16xbf16> to vector<2x16xbf16>
    %cst_91 = arith.constant dense<0.000000e+00> : vector<2x32xf32>
    %159 = tpu.matmul %158, %152, %cst_91 {dimension_numbers = #tpu.dot_dimension_numbers<[1], [0], [0], [1], [0, 0, 1, 1], [], []>} : vector<2x16xbf16>, vector<16x32xbf16>, vector<2x32xf32> -> vector<2x32xf32>
    %160 = arith.addf %150, %159 : vector<2x32xf32>
    %c5_92 = arith.constant 5 : index
    %c0_93 = arith.constant 0 : index
    %c0_94 = arith.constant 0 : index
    %161 = vector.load %arg2[%c5_92, %c0_93, %c0_94] : memref<6x16x32xbf16, #tpu.memory_space<vmem>>, vector<1x16x32xbf16>
    %162 = vector.shape_cast %161 : vector<1x16x32xbf16> to vector<16x32xbf16>
    %163 = vector.extract_strided_slice %108 {offsets = [5, 0, 0], sizes = [1, 2, 16], strides = [1, 1, 1]} : vector<8x3x16xbf16> to vector<1x2x16xbf16>
    %164 = vector.shape_cast %163 : vector<1x2x16xbf16> to vector<2x16xbf16>
    %cst_95 = arith.constant dense<0.000000e+00> : vector<2x32xf32>
    %165 = tpu.matmul %164, %162, %cst_95 {dimension_numbers = #tpu.dot_dimension_numbers<[1], [0], [0], [1], [0, 0, 1, 1], [], []>} : vector<2x16xbf16>, vector<16x32xbf16>, vector<2x32xf32> -> vector<2x32xf32>
    %166 = arith.addf %156, %165 : vector<2x32xf32>
    %167 = vector.extract_strided_slice %108 {offsets = [1, 1, 0], sizes = [1, 2, 16], strides = [1, 1, 1]} : vector<8x3x16xbf16> to vector<1x2x16xbf16>
    %168 = vector.shape_cast %167 : vector<1x2x16xbf16> to vector<2x16xbf16>
    %cst_96 = arith.constant dense<0.000000e+00> : vector<2x32xf32>
    %169 = tpu.matmul %168, %162, %cst_96 {dimension_numbers = #tpu.dot_dimension_numbers<[1], [0], [0], [1], [0, 0, 1, 1], [], []>} : vector<2x16xbf16>, vector<16x32xbf16>, vector<2x32xf32> -> vector<2x32xf32>
    %170 = arith.addf %160, %169 : vector<2x32xf32>
    %171 = vector.broadcast %2 : vector<1x32xf32> to vector<2x32xf32>
    %172 = arith.addf %166, %171 : vector<2x32xf32>
    %173 = vector.broadcast %2 : vector<1x32xf32> to vector<2x32xf32>
    %174 = arith.addf %170, %173 : vector<2x32xf32>
    %cst_97 = arith.constant 0.000000e+00 : f32
    %175 = vector.broadcast %cst_97 : f32 to vector<2x32xf32>
    %176 = arith.cmpf oge, %172, %175 : vector<2x32xf32>
    %cst_98 = arith.constant 1.000000e-01 : f32
    %177 = vector.broadcast %cst_98 : f32 to vector<2x32xf32>
    %178 = arith.mulf %177, %172 : vector<2x32xf32>
    %179 = arith.select %176, %172, %178 : vector<2x32xi1>, vector<2x32xf32>
    %180 = arith.truncf %179 : vector<2x32xf32> to vector<2x32xbf16>
    %cst_99 = arith.constant 0.000000e+00 : f32
    %181 = vector.broadcast %cst_99 : f32 to vector<2x32xf32>
    %182 = arith.cmpf oge, %174, %181 : vector<2x32xf32>
    %cst_100 = arith.constant 1.000000e-01 : f32
    %183 = vector.broadcast %cst_100 : f32 to vector<2x32xf32>
    %184 = arith.mulf %183, %174 : vector<2x32xf32>
    %185 = arith.select %182, %174, %184 : vector<2x32xi1>, vector<2x32xf32>
    %186 = arith.truncf %185 : vector<2x32xf32> to vector<2x32xbf16>
    %c1_101 = arith.constant 1 : index
    %c0_102 = arith.constant 0 : index
    %187 = vector.load %arg7[%c1_101, %c0_102] : memref<3x32xbf16, #tpu.memory_space<vmem>>, vector<2x32xbf16>
    tpu.vector_store %arg7[%c1_101, %c0_102], %186 {strides = array<i32>} : memref<3x32xbf16, #tpu.memory_space<vmem>>, vector<2x32xbf16>,
    %c0_103 = arith.constant 0 : index
    %c0_104 = arith.constant 0 : index
    %188 = vector.load %arg7[%c0_103, %c0_104] : memref<3x32xbf16, #tpu.memory_space<vmem>>, vector<2x32xbf16>
    %c0_105 = arith.constant 0 : index
    %c0_106 = arith.constant 0 : index
    %c0_107 = arith.constant 0 : index
    %189 = vector.load %arg3[%c0_105, %c0_106, %c0_107] : memref<3x32x32xbf16, #tpu.memory_space<vmem>>, vector<1x32x32xbf16>
    %190 = vector.shape_cast %189 : vector<1x32x32xbf16> to vector<32x32xbf16>
    %cst_108 = arith.constant dense<0.000000e+00> : vector<2x32xf32>
    %191 = tpu.matmul %188, %190, %cst_108 {dimension_numbers = #tpu.dot_dimension_numbers<[1], [0], [0], [1], [0, 0, 1, 1], [], []>} : vector<2x32xbf16>, vector<32x32xbf16>, vector<2x32xf32> -> vector<2x32xf32>
    %c1_109 = arith.constant 1 : index
    %c0_110 = arith.constant 0 : index
    %c0_111 = arith.constant 0 : index
    %192 = vector.load %arg3[%c1_109, %c0_110, %c0_111] : memref<3x32x32xbf16, #tpu.memory_space<vmem>>, vector<1x32x32xbf16>
    %193 = vector.shape_cast %192 : vector<1x32x32xbf16> to vector<32x32xbf16>
    %cst_112 = arith.constant dense<0.000000e+00> : vector<2x32xf32>
    %194 = tpu.matmul %180, %193, %cst_112 {dimension_numbers = #tpu.dot_dimension_numbers<[1], [0], [0], [1], [0, 0, 1, 1], [], []>} : vector<2x32xbf16>, vector<32x32xbf16>, vector<2x32xf32> -> vector<2x32xf32>
    %195 = arith.addf %191, %194 : vector<2x32xf32>
    %c2_113 = arith.constant 2 : index
    %c0_114 = arith.constant 0 : index
    %c0_115 = arith.constant 0 : index
    %196 = vector.load %arg3[%c2_113, %c0_114, %c0_115] : memref<3x32x32xbf16, #tpu.memory_space<vmem>>, vector<1x32x32xbf16>
    %197 = vector.shape_cast %196 : vector<1x32x32xbf16> to vector<32x32xbf16>
    %cst_116 = arith.constant dense<0.000000e+00> : vector<2x32xf32>
    %198 = tpu.matmul %186, %197, %cst_116 {dimension_numbers = #tpu.dot_dimension_numbers<[1], [0], [0], [1], [0, 0, 1, 1], [], []>} : vector<2x32xbf16>, vector<32x32xbf16>, vector<2x32xf32> -> vector<2x32xf32>
    %199 = arith.addf %195, %198 : vector<2x32xf32>
    %200 = vector.broadcast %3 : vector<1x32xf32> to vector<2x32xf32>
    %201 = arith.addf %199, %200 : vector<2x32xf32>
    %cst_117 = arith.constant 0.000000e+00 : f32
    %202 = vector.broadcast %cst_117 : f32 to vector<2x32xf32>
    %203 = arith.cmpf oge, %201, %202 : vector<2x32xf32>
    %cst_118 = arith.constant 1.000000e-01 : f32
    %204 = vector.broadcast %cst_118 : f32 to vector<2x32xf32>
    %205 = arith.mulf %204, %201 : vector<2x32xf32>
    %206 = arith.select %203, %201, %205 : vector<2x32xi1>, vector<2x32xf32>
    %c1_119 = arith.constant 1 : index
    %c0_120 = arith.constant 0 : index
    %c0_121 = arith.constant 0 : index
    %207 = vector.load %arg6[%c1_119, %c0_120, %c0_121] : memref<4x2x32xf32, #tpu.memory_space<vmem>>, vector<1x2x32xf32>
    %208 = vector.shape_cast %207 : vector<1x2x32xf32> to vector<2x32xf32>
    %209 = vector.shape_cast %206 : vector<2x32xf32> to vector<1x2x32xf32>
    tpu.vector_store %arg6[%c1_119, %c0_120, %c0_121], %209 {strides = array<i32>} : memref<4x2x32xf32, #tpu.memory_space<vmem>>, vector<1x2x32xf32>,
    %c2_122 = arith.constant 2 : index
    %c0_123 = arith.constant 0 : index
    %c0_124 = arith.constant 0 : index
    %c0_125 = arith.constant 0 : index
    %210 = vector.load %arg1[%c2_122, %c0_123, %c0_124, %c0_125] : memref<4x8x3x16xbf16, #tpu.memory_space<vmem>>, vector<1x8x3x16xbf16>
    %211 = vector.shape_cast %210 : vector<1x8x3x16xbf16> to vector<8x3x16xbf16>
    %cst_126 = arith.constant 0.000000e+00 : f32
    %212 = vector.broadcast %cst_126 : f32 to vector<2x32xf32>
    %cst_127 = arith.constant 0.000000e+00 : f32
    %213 = vector.broadcast %cst_127 : f32 to vector<2x32xf32>
    %c0_128 = arith.constant 0 : index
    %c0_129 = arith.constant 0 : index
    %c0_130 = arith.constant 0 : index
    %214 = vector.load %arg2[%c0_128, %c0_129, %c0_130] : memref<6x16x32xbf16, #tpu.memory_space<vmem>>, vector<1x16x32xbf16>
    %215 = vector.shape_cast %214 : vector<1x16x32xbf16> to vector<16x32xbf16>
    %216 = vector.extract_strided_slice %211 {offsets = [0, 0, 0], sizes = [1, 2, 16], strides = [1, 1, 1]} : vector<8x3x16xbf16> to vector<1x2x16xbf16>
    %217 = vector.shape_cast %216 : vector<1x2x16xbf16> to vector<2x16xbf16>
    %cst_131 = arith.constant dense<0.000000e+00> : vector<2x32xf32>
    %218 = tpu.matmul %217, %215, %cst_131 {dimension_numbers = #tpu.dot_dimension_numbers<[1], [0], [0], [1], [0, 0, 1, 1], [], []>} : vector<2x16xbf16>, vector<16x32xbf16>, vector<2x32xf32> -> vector<2x32xf32>
    %219 = arith.addf %212, %218 : vector<2x32xf32>
    %220 = vector.extract_strided_slice %211 {offsets = [4, 0, 0], sizes = [1, 2, 16], strides = [1, 1, 1]} : vector<8x3x16xbf16> to vector<1x2x16xbf16>
    %221 = vector.shape_cast %220 : vector<1x2x16xbf16> to vector<2x16xbf16>
    %cst_132 = arith.constant dense<0.000000e+00> : vector<2x32xf32>
    %222 = tpu.matmul %221, %215, %cst_132 {dimension_numbers = #tpu.dot_dimension_numbers<[1], [0], [0], [1], [0, 0, 1, 1], [], []>} : vector<2x16xbf16>, vector<16x32xbf16>, vector<2x32xf32> -> vector<2x32xf32>
    %223 = arith.addf %213, %222 : vector<2x32xf32>
    %c1_133 = arith.constant 1 : index
    %c0_134 = arith.constant 0 : index
    %c0_135 = arith.constant 0 : index
    %224 = vector.load %arg2[%c1_133, %c0_134, %c0_135] : memref<6x16x32xbf16, #tpu.memory_space<vmem>>, vector<1x16x32xbf16>
    %225 = vector.shape_cast %224 : vector<1x16x32xbf16> to vector<16x32xbf16>
    %226 = vector.extract_strided_slice %211 {offsets = [1, 0, 0], sizes = [1, 2, 16], strides = [1, 1, 1]} : vector<8x3x16xbf16> to vector<1x2x16xbf16>
    %227 = vector.shape_cast %226 : vector<1x2x16xbf16> to vector<2x16xbf16>
    %cst_136 = arith.constant dense<0.000000e+00> : vector<2x32xf32>
    %228 = tpu.matmul %227, %225, %cst_136 {dimension_numbers = #tpu.dot_dimension_numbers<[1], [0], [0], [1], [0, 0, 1, 1], [], []>} : vector<2x16xbf16>, vector<16x32xbf16>, vector<2x32xf32> -> vector<2x32xf32>
    %229 = arith.addf %219, %228 : vector<2x32xf32>
    %230 = vector.extract_strided_slice %211 {offsets = [5, 0, 0], sizes = [1, 2, 16], strides = [1, 1, 1]} : vector<8x3x16xbf16> to vector<1x2x16xbf16>
    %231 = vector.shape_cast %230 : vector<1x2x16xbf16> to vector<2x16xbf16>
    %cst_137 = arith.constant dense<0.000000e+00> : vector<2x32xf32>
    %232 = tpu.matmul %231, %225, %cst_137 {dimension_numbers = #tpu.dot_dimension_numbers<[1], [0], [0], [1], [0, 0, 1, 1], [], []>} : vector<2x16xbf16>, vector<16x32xbf16>, vector<2x32xf32> -> vector<2x32xf32>
    %233 = arith.addf %223, %232 : vector<2x32xf32>
    %c2_138 = arith.constant 2 : index
    %c0_139 = arith.constant 0 : index
    %c0_140 = arith.constant 0 : index
    %234 = vector.load %arg2[%c2_138, %c0_139, %c0_140] : memref<6x16x32xbf16, #tpu.memory_space<vmem>>, vector<1x16x32xbf16>
    %235 = vector.shape_cast %234 : vector<1x16x32xbf16> to vector<16x32xbf16>
    %236 = vector.extract_strided_slice %211 {offsets = [2, 0, 0], sizes = [1, 2, 16], strides = [1, 1, 1]} : vector<8x3x16xbf16> to vector<1x2x16xbf16>
    %237 = vector.shape_cast %236 : vector<1x2x16xbf16> to vector<2x16xbf16>
    %cst_141 = arith.constant dense<0.000000e+00> : vector<2x32xf32>
    %238 = tpu.matmul %237, %235, %cst_141 {dimension_numbers = #tpu.dot_dimension_numbers<[1], [0], [0], [1], [0, 0, 1, 1], [], []>} : vector<2x16xbf16>, vector<16x32xbf16>, vector<2x32xf32> -> vector<2x32xf32>
    %239 = arith.addf %229, %238 : vector<2x32xf32>
    %240 = vector.extract_strided_slice %211 {offsets = [6, 0, 0], sizes = [1, 2, 16], strides = [1, 1, 1]} : vector<8x3x16xbf16> to vector<1x2x16xbf16>
    %241 = vector.shape_cast %240 : vector<1x2x16xbf16> to vector<2x16xbf16>
    %cst_142 = arith.constant dense<0.000000e+00> : vector<2x32xf32>
    %242 = tpu.matmul %241, %235, %cst_142 {dimension_numbers = #tpu.dot_dimension_numbers<[1], [0], [0], [1], [0, 0, 1, 1], [], []>} : vector<2x16xbf16>, vector<16x32xbf16>, vector<2x32xf32> -> vector<2x32xf32>
    %243 = arith.addf %233, %242 : vector<2x32xf32>
    %c3_143 = arith.constant 3 : index
    %c0_144 = arith.constant 0 : index
    %c0_145 = arith.constant 0 : index
    %244 = vector.load %arg2[%c3_143, %c0_144, %c0_145] : memref<6x16x32xbf16, #tpu.memory_space<vmem>>, vector<1x16x32xbf16>
    %245 = vector.shape_cast %244 : vector<1x16x32xbf16> to vector<16x32xbf16>
    %246 = vector.extract_strided_slice %211 {offsets = [3, 0, 0], sizes = [1, 2, 16], strides = [1, 1, 1]} : vector<8x3x16xbf16> to vector<1x2x16xbf16>
    %247 = vector.shape_cast %246 : vector<1x2x16xbf16> to vector<2x16xbf16>
    %cst_146 = arith.constant dense<0.000000e+00> : vector<2x32xf32>
    %248 = tpu.matmul %247, %245, %cst_146 {dimension_numbers = #tpu.dot_dimension_numbers<[1], [0], [0], [1], [0, 0, 1, 1], [], []>} : vector<2x16xbf16>, vector<16x32xbf16>, vector<2x32xf32> -> vector<2x32xf32>
    %249 = arith.addf %239, %248 : vector<2x32xf32>
    %250 = vector.extract_strided_slice %211 {offsets = [7, 0, 0], sizes = [1, 2, 16], strides = [1, 1, 1]} : vector<8x3x16xbf16> to vector<1x2x16xbf16>
    %251 = vector.shape_cast %250 : vector<1x2x16xbf16> to vector<2x16xbf16>
    %cst_147 = arith.constant dense<0.000000e+00> : vector<2x32xf32>
    %252 = tpu.matmul %251, %245, %cst_147 {dimension_numbers = #tpu.dot_dimension_numbers<[1], [0], [0], [1], [0, 0, 1, 1], [], []>} : vector<2x16xbf16>, vector<16x32xbf16>, vector<2x32xf32> -> vector<2x32xf32>
    %253 = arith.addf %243, %252 : vector<2x32xf32>
    %c4_148 = arith.constant 4 : index
    %c0_149 = arith.constant 0 : index
    %c0_150 = arith.constant 0 : index
    %254 = vector.load %arg2[%c4_148, %c0_149, %c0_150] : memref<6x16x32xbf16, #tpu.memory_space<vmem>>, vector<1x16x32xbf16>
    %255 = vector.shape_cast %254 : vector<1x16x32xbf16> to vector<16x32xbf16>
    %256 = vector.extract_strided_slice %211 {offsets = [4, 0, 0], sizes = [1, 2, 16], strides = [1, 1, 1]} : vector<8x3x16xbf16> to vector<1x2x16xbf16>
    %257 = vector.shape_cast %256 : vector<1x2x16xbf16> to vector<2x16xbf16>
    %cst_151 = arith.constant dense<0.000000e+00> : vector<2x32xf32>
    %258 = tpu.matmul %257, %255, %cst_151 {dimension_numbers = #tpu.dot_dimension_numbers<[1], [0], [0], [1], [0, 0, 1, 1], [], []>} : vector<2x16xbf16>, vector<16x32xbf16>, vector<2x32xf32> -> vector<2x32xf32>
    %259 = arith.addf %249, %258 : vector<2x32xf32>
    %260 = vector.extract_strided_slice %211 {offsets = [0, 1, 0], sizes = [1, 2, 16], strides = [1, 1, 1]} : vector<8x3x16xbf16> to vector<1x2x16xbf16>
    %261 = vector.shape_cast %260 : vector<1x2x16xbf16> to vector<2x16xbf16>
    %cst_152 = arith.constant dense<0.000000e+00> : vector<2x32xf32>
    %262 = tpu.matmul %261, %255, %cst_152 {dimension_numbers = #tpu.dot_dimension_numbers<[1], [0], [0], [1], [0, 0, 1, 1], [], []>} : vector<2x16xbf16>, vector<16x32xbf16>, vector<2x32xf32> -> vector<2x32xf32>
    %263 = arith.addf %253, %262 : vector<2x32xf32>
    %c5_153 = arith.constant 5 : index
    %c0_154 = arith.constant 0 : index
    %c0_155 = arith.constant 0 : index
    %264 = vector.load %arg2[%c5_153, %c0_154, %c0_155] : memref<6x16x32xbf16, #tpu.memory_space<vmem>>, vector<1x16x32xbf16>
    %265 = vector.shape_cast %264 : vector<1x16x32xbf16> to vector<16x32xbf16>
    %266 = vector.extract_strided_slice %211 {offsets = [5, 0, 0], sizes = [1, 2, 16], strides = [1, 1, 1]} : vector<8x3x16xbf16> to vector<1x2x16xbf16>
    %267 = vector.shape_cast %266 : vector<1x2x16xbf16> to vector<2x16xbf16>
    %cst_156 = arith.constant dense<0.000000e+00> : vector<2x32xf32>
    %268 = tpu.matmul %267, %265, %cst_156 {dimension_numbers = #tpu.dot_dimension_numbers<[1], [0], [0], [1], [0, 0, 1, 1], [], []>} : vector<2x16xbf16>, vector<16x32xbf16>, vector<2x32xf32> -> vector<2x32xf32>
    %269 = arith.addf %259, %268 : vector<2x32xf32>
    %270 = vector.extract_strided_slice %211 {offsets = [1, 1, 0], sizes = [1, 2, 16], strides = [1, 1, 1]} : vector<8x3x16xbf16> to vector<1x2x16xbf16>
    %271 = vector.shape_cast %270 : vector<1x2x16xbf16> to vector<2x16xbf16>
    %cst_157 = arith.constant dense<0.000000e+00> : vector<2x32xf32>
    %272 = tpu.matmul %271, %265, %cst_157 {dimension_numbers = #tpu.dot_dimension_numbers<[1], [0], [0], [1], [0, 0, 1, 1], [], []>} : vector<2x16xbf16>, vector<16x32xbf16>, vector<2x32xf32> -> vector<2x32xf32>
    %273 = arith.addf %263, %272 : vector<2x32xf32>
    %274 = vector.broadcast %2 : vector<1x32xf32> to vector<2x32xf32>
    %275 = arith.addf %269, %274 : vector<2x32xf32>
    %276 = vector.broadcast %2 : vector<1x32xf32> to vector<2x32xf32>
    %277 = arith.addf %273, %276 : vector<2x32xf32>
    %cst_158 = arith.constant 0.000000e+00 : f32
    %278 = vector.broadcast %cst_158 : f32 to vector<2x32xf32>
    %279 = arith.cmpf oge, %275, %278 : vector<2x32xf32>
    %cst_159 = arith.constant 1.000000e-01 : f32
    %280 = vector.broadcast %cst_159 : f32 to vector<2x32xf32>
    %281 = arith.mulf %280, %275 : vector<2x32xf32>
    %282 = arith.select %279, %275, %281 : vector<2x32xi1>, vector<2x32xf32>
    %283 = arith.truncf %282 : vector<2x32xf32> to vector<2x32xbf16>
    %cst_160 = arith.constant 0.000000e+00 : f32
    %284 = vector.broadcast %cst_160 : f32 to vector<2x32xf32>
    %285 = arith.cmpf oge, %277, %284 : vector<2x32xf32>
    %cst_161 = arith.constant 1.000000e-01 : f32
    %286 = vector.broadcast %cst_161 : f32 to vector<2x32xf32>
    %287 = arith.mulf %286, %277 : vector<2x32xf32>
    %288 = arith.select %285, %277, %287 : vector<2x32xi1>, vector<2x32xf32>
    %289 = arith.truncf %288 : vector<2x32xf32> to vector<2x32xbf16>
    %c1_162 = arith.constant 1 : index
    %c0_163 = arith.constant 0 : index
    %290 = vector.load %arg7[%c1_162, %c0_163] : memref<3x32xbf16, #tpu.memory_space<vmem>>, vector<2x32xbf16>
    tpu.vector_store %arg7[%c1_162, %c0_163], %289 {strides = array<i32>} : memref<3x32xbf16, #tpu.memory_space<vmem>>, vector<2x32xbf16>,
    %c0_164 = arith.constant 0 : index
    %c0_165 = arith.constant 0 : index
    %291 = vector.load %arg7[%c0_164, %c0_165] : memref<3x32xbf16, #tpu.memory_space<vmem>>, vector<2x32xbf16>
    %c0_166 = arith.constant 0 : index
    %c0_167 = arith.constant 0 : index
    %c0_168 = arith.constant 0 : index
    %292 = vector.load %arg3[%c0_166, %c0_167, %c0_168] : memref<3x32x32xbf16, #tpu.memory_space<vmem>>, vector<1x32x32xbf16>
    %293 = vector.shape_cast %292 : vector<1x32x32xbf16> to vector<32x32xbf16>
    %cst_169 = arith.constant dense<0.000000e+00> : vector<2x32xf32>
    %294 = tpu.matmul %291, %293, %cst_169 {dimension_numbers = #tpu.dot_dimension_numbers<[1], [0], [0], [1], [0, 0, 1, 1], [], []>} : vector<2x32xbf16>, vector<32x32xbf16>, vector<2x32xf32> -> vector<2x32xf32>
    %c1_170 = arith.constant 1 : index
    %c0_171 = arith.constant 0 : index
    %c0_172 = arith.constant 0 : index
    %295 = vector.load %arg3[%c1_170, %c0_171, %c0_172] : memref<3x32x32xbf16, #tpu.memory_space<vmem>>, vector<1x32x32xbf16>
    %296 = vector.shape_cast %295 : vector<1x32x32xbf16> to vector<32x32xbf16>
    %cst_173 = arith.constant dense<0.000000e+00> : vector<2x32xf32>
    %297 = tpu.matmul %283, %296, %cst_173 {dimension_numbers = #tpu.dot_dimension_numbers<[1], [0], [0], [1], [0, 0, 1, 1], [], []>} : vector<2x32xbf16>, vector<32x32xbf16>, vector<2x32xf32> -> vector<2x32xf32>
    %298 = arith.addf %294, %297 : vector<2x32xf32>
    %c2_174 = arith.constant 2 : index
    %c0_175 = arith.constant 0 : index
    %c0_176 = arith.constant 0 : index
    %299 = vector.load %arg3[%c2_174, %c0_175, %c0_176] : memref<3x32x32xbf16, #tpu.memory_space<vmem>>, vector<1x32x32xbf16>
    %300 = vector.shape_cast %299 : vector<1x32x32xbf16> to vector<32x32xbf16>
    %cst_177 = arith.constant dense<0.000000e+00> : vector<2x32xf32>
    %301 = tpu.matmul %289, %300, %cst_177 {dimension_numbers = #tpu.dot_dimension_numbers<[1], [0], [0], [1], [0, 0, 1, 1], [], []>} : vector<2x32xbf16>, vector<32x32xbf16>, vector<2x32xf32> -> vector<2x32xf32>
    %302 = arith.addf %298, %301 : vector<2x32xf32>
    %303 = vector.broadcast %3 : vector<1x32xf32> to vector<2x32xf32>
    %304 = arith.addf %302, %303 : vector<2x32xf32>
    %cst_178 = arith.constant 0.000000e+00 : f32
    %305 = vector.broadcast %cst_178 : f32 to vector<2x32xf32>
    %306 = arith.cmpf oge, %304, %305 : vector<2x32xf32>
    %cst_179 = arith.constant 1.000000e-01 : f32
    %307 = vector.broadcast %cst_179 : f32 to vector<2x32xf32>
    %308 = arith.mulf %307, %304 : vector<2x32xf32>
    %309 = arith.select %306, %304, %308 : vector<2x32xi1>, vector<2x32xf32>
    %c2_180 = arith.constant 2 : index
    %c0_181 = arith.constant 0 : index
    %c0_182 = arith.constant 0 : index
    %310 = vector.load %arg6[%c2_180, %c0_181, %c0_182] : memref<4x2x32xf32, #tpu.memory_space<vmem>>, vector<1x2x32xf32>
    %311 = vector.shape_cast %310 : vector<1x2x32xf32> to vector<2x32xf32>
    %312 = vector.shape_cast %309 : vector<2x32xf32> to vector<1x2x32xf32>
    tpu.vector_store %arg6[%c2_180, %c0_181, %c0_182], %312 {strides = array<i32>} : memref<4x2x32xf32, #tpu.memory_space<vmem>>, vector<1x2x32xf32>,
    %c3_183 = arith.constant 3 : index
    %c0_184 = arith.constant 0 : index
    %c0_185 = arith.constant 0 : index
    %c0_186 = arith.constant 0 : index
    %313 = vector.load %arg1[%c3_183, %c0_184, %c0_185, %c0_186] : memref<4x8x3x16xbf16, #tpu.memory_space<vmem>>, vector<1x8x3x16xbf16>
    %314 = vector.shape_cast %313 : vector<1x8x3x16xbf16> to vector<8x3x16xbf16>
    %cst_187 = arith.constant 0.000000e+00 : f32
    %315 = vector.broadcast %cst_187 : f32 to vector<2x32xf32>
    %cst_188 = arith.constant 0.000000e+00 : f32
    %316 = vector.broadcast %cst_188 : f32 to vector<2x32xf32>
    %c0_189 = arith.constant 0 : index
    %c0_190 = arith.constant 0 : index
    %c0_191 = arith.constant 0 : index
    %317 = vector.load %arg2[%c0_189, %c0_190, %c0_191] : memref<6x16x32xbf16, #tpu.memory_space<vmem>>, vector<1x16x32xbf16>
    %318 = vector.shape_cast %317 : vector<1x16x32xbf16> to vector<16x32xbf16>
    %319 = vector.extract_strided_slice %314 {offsets = [0, 0, 0], sizes = [1, 2, 16], strides = [1, 1, 1]} : vector<8x3x16xbf16> to vector<1x2x16xbf16>
    %320 = vector.shape_cast %319 : vector<1x2x16xbf16> to vector<2x16xbf16>
    %cst_192 = arith.constant dense<0.000000e+00> : vector<2x32xf32>
    %321 = tpu.matmul %320, %318, %cst_192 {dimension_numbers = #tpu.dot_dimension_numbers<[1], [0], [0], [1], [0, 0, 1, 1], [], []>} : vector<2x16xbf16>, vector<16x32xbf16>, vector<2x32xf32> -> vector<2x32xf32>
    %322 = arith.addf %315, %321 : vector<2x32xf32>
    %323 = vector.extract_strided_slice %314 {offsets = [4, 0, 0], sizes = [1, 2, 16], strides = [1, 1, 1]} : vector<8x3x16xbf16> to vector<1x2x16xbf16>
    %324 = vector.shape_cast %323 : vector<1x2x16xbf16> to vector<2x16xbf16>
    %cst_193 = arith.constant dense<0.000000e+00> : vector<2x32xf32>
    %325 = tpu.matmul %324, %318, %cst_193 {dimension_numbers = #tpu.dot_dimension_numbers<[1], [0], [0], [1], [0, 0, 1, 1], [], []>} : vector<2x16xbf16>, vector<16x32xbf16>, vector<2x32xf32> -> vector<2x32xf32>
    %326 = arith.addf %316, %325 : vector<2x32xf32>
    %c1_194 = arith.constant 1 : index
    %c0_195 = arith.constant 0 : index
    %c0_196 = arith.constant 0 : index
    %327 = vector.load %arg2[%c1_194, %c0_195, %c0_196] : memref<6x16x32xbf16, #tpu.memory_space<vmem>>, vector<1x16x32xbf16>
    %328 = vector.shape_cast %327 : vector<1x16x32xbf16> to vector<16x32xbf16>
    %329 = vector.extract_strided_slice %314 {offsets = [1, 0, 0], sizes = [1, 2, 16], strides = [1, 1, 1]} : vector<8x3x16xbf16> to vector<1x2x16xbf16>
    %330 = vector.shape_cast %329 : vector<1x2x16xbf16> to vector<2x16xbf16>
    %cst_197 = arith.constant dense<0.000000e+00> : vector<2x32xf32>
    %331 = tpu.matmul %330, %328, %cst_197 {dimension_numbers = #tpu.dot_dimension_numbers<[1], [0], [0], [1], [0, 0, 1, 1], [], []>} : vector<2x16xbf16>, vector<16x32xbf16>, vector<2x32xf32> -> vector<2x32xf32>
    %332 = arith.addf %322, %331 : vector<2x32xf32>
    %333 = vector.extract_strided_slice %314 {offsets = [5, 0, 0], sizes = [1, 2, 16], strides = [1, 1, 1]} : vector<8x3x16xbf16> to vector<1x2x16xbf16>
    %334 = vector.shape_cast %333 : vector<1x2x16xbf16> to vector<2x16xbf16>
    %cst_198 = arith.constant dense<0.000000e+00> : vector<2x32xf32>
    %335 = tpu.matmul %334, %328, %cst_198 {dimension_numbers = #tpu.dot_dimension_numbers<[1], [0], [0], [1], [0, 0, 1, 1], [], []>} : vector<2x16xbf16>, vector<16x32xbf16>, vector<2x32xf32> -> vector<2x32xf32>
    %336 = arith.addf %326, %335 : vector<2x32xf32>
    %c2_199 = arith.constant 2 : index
    %c0_200 = arith.constant 0 : index
    %c0_201 = arith.constant 0 : index
    %337 = vector.load %arg2[%c2_199, %c0_200, %c0_201] : memref<6x16x32xbf16, #tpu.memory_space<vmem>>, vector<1x16x32xbf16>
    %338 = vector.shape_cast %337 : vector<1x16x32xbf16> to vector<16x32xbf16>
    %339 = vector.extract_strided_slice %314 {offsets = [2, 0, 0], sizes = [1, 2, 16], strides = [1, 1, 1]} : vector<8x3x16xbf16> to vector<1x2x16xbf16>
    %340 = vector.shape_cast %339 : vector<1x2x16xbf16> to vector<2x16xbf16>
    %cst_202 = arith.constant dense<0.000000e+00> : vector<2x32xf32>
    %341 = tpu.matmul %340, %338, %cst_202 {dimension_numbers = #tpu.dot_dimension_numbers<[1], [0], [0], [1], [0, 0, 1, 1], [], []>} : vector<2x16xbf16>, vector<16x32xbf16>, vector<2x32xf32> -> vector<2x32xf32>
    %342 = arith.addf %332, %341 : vector<2x32xf32>
    %343 = vector.extract_strided_slice %314 {offsets = [6, 0, 0], sizes = [1, 2, 16], strides = [1, 1, 1]} : vector<8x3x16xbf16> to vector<1x2x16xbf16>
    %344 = vector.shape_cast %343 : vector<1x2x16xbf16> to vector<2x16xbf16>
    %cst_203 = arith.constant dense<0.000000e+00> : vector<2x32xf32>
    %345 = tpu.matmul %344, %338, %cst_203 {dimension_numbers = #tpu.dot_dimension_numbers<[1], [0], [0], [1], [0, 0, 1, 1], [], []>} : vector<2x16xbf16>, vector<16x32xbf16>, vector<2x32xf32> -> vector<2x32xf32>
    %346 = arith.addf %336, %345 : vector<2x32xf32>
    %c3_204 = arith.constant 3 : index
    %c0_205 = arith.constant 0 : index
    %c0_206 = arith.constant 0 : index
    %347 = vector.load %arg2[%c3_204, %c0_205, %c0_206] : memref<6x16x32xbf16, #tpu.memory_space<vmem>>, vector<1x16x32xbf16>
    %348 = vector.shape_cast %347 : vector<1x16x32xbf16> to vector<16x32xbf16>
    %349 = vector.extract_strided_slice %314 {offsets = [3, 0, 0], sizes = [1, 2, 16], strides = [1, 1, 1]} : vector<8x3x16xbf16> to vector<1x2x16xbf16>
    %350 = vector.shape_cast %349 : vector<1x2x16xbf16> to vector<2x16xbf16>
    %cst_207 = arith.constant dense<0.000000e+00> : vector<2x32xf32>
    %351 = tpu.matmul %350, %348, %cst_207 {dimension_numbers = #tpu.dot_dimension_numbers<[1], [0], [0], [1], [0, 0, 1, 1], [], []>} : vector<2x16xbf16>, vector<16x32xbf16>, vector<2x32xf32> -> vector<2x32xf32>
    %352 = arith.addf %342, %351 : vector<2x32xf32>
    %353 = vector.extract_strided_slice %314 {offsets = [7, 0, 0], sizes = [1, 2, 16], strides = [1, 1, 1]} : vector<8x3x16xbf16> to vector<1x2x16xbf16>
    %354 = vector.shape_cast %353 : vector<1x2x16xbf16> to vector<2x16xbf16>
    %cst_208 = arith.constant dense<0.000000e+00> : vector<2x32xf32>
    %355 = tpu.matmul %354, %348, %cst_208 {dimension_numbers = #tpu.dot_dimension_numbers<[1], [0], [0], [1], [0, 0, 1, 1], [], []>} : vector<2x16xbf16>, vector<16x32xbf16>, vector<2x32xf32> -> vector<2x32xf32>
    %356 = arith.addf %346, %355 : vector<2x32xf32>
    %c4_209 = arith.constant 4 : index
    %c0_210 = arith.constant 0 : index
    %c0_211 = arith.constant 0 : index
    %357 = vector.load %arg2[%c4_209, %c0_210, %c0_211] : memref<6x16x32xbf16, #tpu.memory_space<vmem>>, vector<1x16x32xbf16>
    %358 = vector.shape_cast %357 : vector<1x16x32xbf16> to vector<16x32xbf16>
    %359 = vector.extract_strided_slice %314 {offsets = [4, 0, 0], sizes = [1, 2, 16], strides = [1, 1, 1]} : vector<8x3x16xbf16> to vector<1x2x16xbf16>
    %360 = vector.shape_cast %359 : vector<1x2x16xbf16> to vector<2x16xbf16>
    %cst_212 = arith.constant dense<0.000000e+00> : vector<2x32xf32>
    %361 = tpu.matmul %360, %358, %cst_212 {dimension_numbers = #tpu.dot_dimension_numbers<[1], [0], [0], [1], [0, 0, 1, 1], [], []>} : vector<2x16xbf16>, vector<16x32xbf16>, vector<2x32xf32> -> vector<2x32xf32>
    %362 = arith.addf %352, %361 : vector<2x32xf32>
    %363 = vector.extract_strided_slice %314 {offsets = [0, 1, 0], sizes = [1, 2, 16], strides = [1, 1, 1]} : vector<8x3x16xbf16> to vector<1x2x16xbf16>
    %364 = vector.shape_cast %363 : vector<1x2x16xbf16> to vector<2x16xbf16>
    %cst_213 = arith.constant dense<0.000000e+00> : vector<2x32xf32>
    %365 = tpu.matmul %364, %358, %cst_213 {dimension_numbers = #tpu.dot_dimension_numbers<[1], [0], [0], [1], [0, 0, 1, 1], [], []>} : vector<2x16xbf16>, vector<16x32xbf16>, vector<2x32xf32> -> vector<2x32xf32>
    %366 = arith.addf %356, %365 : vector<2x32xf32>
    %c5_214 = arith.constant 5 : index
    %c0_215 = arith.constant 0 : index
    %c0_216 = arith.constant 0 : index
    %367 = vector.load %arg2[%c5_214, %c0_215, %c0_216] : memref<6x16x32xbf16, #tpu.memory_space<vmem>>, vector<1x16x32xbf16>
    %368 = vector.shape_cast %367 : vector<1x16x32xbf16> to vector<16x32xbf16>
    %369 = vector.extract_strided_slice %314 {offsets = [5, 0, 0], sizes = [1, 2, 16], strides = [1, 1, 1]} : vector<8x3x16xbf16> to vector<1x2x16xbf16>
    %370 = vector.shape_cast %369 : vector<1x2x16xbf16> to vector<2x16xbf16>
    %cst_217 = arith.constant dense<0.000000e+00> : vector<2x32xf32>
    %371 = tpu.matmul %370, %368, %cst_217 {dimension_numbers = #tpu.dot_dimension_numbers<[1], [0], [0], [1], [0, 0, 1, 1], [], []>} : vector<2x16xbf16>, vector<16x32xbf16>, vector<2x32xf32> -> vector<2x32xf32>
    %372 = arith.addf %362, %371 : vector<2x32xf32>
    %373 = vector.extract_strided_slice %314 {offsets = [1, 1, 0], sizes = [1, 2, 16], strides = [1, 1, 1]} : vector<8x3x16xbf16> to vector<1x2x16xbf16>
    %374 = vector.shape_cast %373 : vector<1x2x16xbf16> to vector<2x16xbf16>
    %cst_218 = arith.constant dense<0.000000e+00> : vector<2x32xf32>
    %375 = tpu.matmul %374, %368, %cst_218 {dimension_numbers = #tpu.dot_dimension_numbers<[1], [0], [0], [1], [0, 0, 1, 1], [], []>} : vector<2x16xbf16>, vector<16x32xbf16>, vector<2x32xf32> -> vector<2x32xf32>
    %376 = arith.addf %366, %375 : vector<2x32xf32>
    %377 = vector.broadcast %2 : vector<1x32xf32> to vector<2x32xf32>
    %378 = arith.addf %372, %377 : vector<2x32xf32>
    %379 = vector.broadcast %2 : vector<1x32xf32> to vector<2x32xf32>
    %380 = arith.addf %376, %379 : vector<2x32xf32>
    %cst_219 = arith.constant 0.000000e+00 : f32
    %381 = vector.broadcast %cst_219 : f32 to vector<2x32xf32>
    %382 = arith.cmpf oge, %378, %381 : vector<2x32xf32>
    %cst_220 = arith.constant 1.000000e-01 : f32
    %383 = vector.broadcast %cst_220 : f32 to vector<2x32xf32>
    %384 = arith.mulf %383, %378 : vector<2x32xf32>
    %385 = arith.select %382, %378, %384 : vector<2x32xi1>, vector<2x32xf32>
    %386 = arith.truncf %385 : vector<2x32xf32> to vector<2x32xbf16>
    %cst_221 = arith.constant 0.000000e+00 : f32
    %387 = vector.broadcast %cst_221 : f32 to vector<2x32xf32>
    %388 = arith.cmpf oge, %380, %387 : vector<2x32xf32>
    %cst_222 = arith.constant 1.000000e-01 : f32
    %389 = vector.broadcast %cst_222 : f32 to vector<2x32xf32>
    %390 = arith.mulf %389, %380 : vector<2x32xf32>
    %391 = arith.select %388, %380, %390 : vector<2x32xi1>, vector<2x32xf32>
    %392 = arith.truncf %391 : vector<2x32xf32> to vector<2x32xbf16>
    %c1_223 = arith.constant 1 : index
    %c0_224 = arith.constant 0 : index
    %393 = vector.load %arg7[%c1_223, %c0_224] : memref<3x32xbf16, #tpu.memory_space<vmem>>, vector<2x32xbf16>
    tpu.vector_store %arg7[%c1_223, %c0_224], %392 {strides = array<i32>} : memref<3x32xbf16, #tpu.memory_space<vmem>>, vector<2x32xbf16>,
    %c0_225 = arith.constant 0 : index
    %c0_226 = arith.constant 0 : index
    %394 = vector.load %arg7[%c0_225, %c0_226] : memref<3x32xbf16, #tpu.memory_space<vmem>>, vector<2x32xbf16>
    %c0_227 = arith.constant 0 : index
    %c0_228 = arith.constant 0 : index
    %c0_229 = arith.constant 0 : index
    %395 = vector.load %arg3[%c0_227, %c0_228, %c0_229] : memref<3x32x32xbf16, #tpu.memory_space<vmem>>, vector<1x32x32xbf16>
    %396 = vector.shape_cast %395 : vector<1x32x32xbf16> to vector<32x32xbf16>
    %cst_230 = arith.constant dense<0.000000e+00> : vector<2x32xf32>
    %397 = tpu.matmul %394, %396, %cst_230 {dimension_numbers = #tpu.dot_dimension_numbers<[1], [0], [0], [1], [0, 0, 1, 1], [], []>} : vector<2x32xbf16>, vector<32x32xbf16>, vector<2x32xf32> -> vector<2x32xf32>
    %c1_231 = arith.constant 1 : index
    %c0_232 = arith.constant 0 : index
    %c0_233 = arith.constant 0 : index
    %398 = vector.load %arg3[%c1_231, %c0_232, %c0_233] : memref<3x32x32xbf16, #tpu.memory_space<vmem>>, vector<1x32x32xbf16>
    %399 = vector.shape_cast %398 : vector<1x32x32xbf16> to vector<32x32xbf16>
    %cst_234 = arith.constant dense<0.000000e+00> : vector<2x32xf32>
    %400 = tpu.matmul %386, %399, %cst_234 {dimension_numbers = #tpu.dot_dimension_numbers<[1], [0], [0], [1], [0, 0, 1, 1], [], []>} : vector<2x32xbf16>, vector<32x32xbf16>, vector<2x32xf32> -> vector<2x32xf32>
    %401 = arith.addf %397, %400 : vector<2x32xf32>
    %c2_235 = arith.constant 2 : index
    %c0_236 = arith.constant 0 : index
    %c0_237 = arith.constant 0 : index
    %402 = vector.load %arg3[%c2_235, %c0_236, %c0_237] : memref<3x32x32xbf16, #tpu.memory_space<vmem>>, vector<1x32x32xbf16>
    %403 = vector.shape_cast %402 : vector<1x32x32xbf16> to vector<32x32xbf16>
    %cst_238 = arith.constant dense<0.000000e+00> : vector<2x32xf32>
    %404 = tpu.matmul %392, %403, %cst_238 {dimension_numbers = #tpu.dot_dimension_numbers<[1], [0], [0], [1], [0, 0, 1, 1], [], []>} : vector<2x32xbf16>, vector<32x32xbf16>, vector<2x32xf32> -> vector<2x32xf32>
    %405 = arith.addf %401, %404 : vector<2x32xf32>
    %406 = vector.broadcast %3 : vector<1x32xf32> to vector<2x32xf32>
    %407 = arith.addf %405, %406 : vector<2x32xf32>
    %cst_239 = arith.constant 0.000000e+00 : f32
    %408 = vector.broadcast %cst_239 : f32 to vector<2x32xf32>
    %409 = arith.cmpf oge, %407, %408 : vector<2x32xf32>
    %cst_240 = arith.constant 1.000000e-01 : f32
    %410 = vector.broadcast %cst_240 : f32 to vector<2x32xf32>
    %411 = arith.mulf %410, %407 : vector<2x32xf32>
    %412 = arith.select %409, %407, %411 : vector<2x32xi1>, vector<2x32xf32>
    %c3_241 = arith.constant 3 : index
    %c0_242 = arith.constant 0 : index
    %c0_243 = arith.constant 0 : index
    %413 = vector.load %arg6[%c3_241, %c0_242, %c0_243] : memref<4x2x32xf32, #tpu.memory_space<vmem>>, vector<1x2x32xf32>
    %414 = vector.shape_cast %413 : vector<1x2x32xf32> to vector<2x32xf32>
    %415 = vector.shape_cast %412 : vector<2x32xf32> to vector<1x2x32xf32>
    tpu.vector_store %arg6[%c3_241, %c0_242, %c0_243], %415 {strides = array<i32>} : memref<4x2x32xf32, #tpu.memory_space<vmem>>, vector<1x2x32xf32>,
    return
  }
  func.func @transform_0(%arg0: i32) -> (i32, i32, i32, i32) {
    %c0_i32 = arith.constant 0 : i32
    %c0_i32_0 = arith.constant 0 : i32
    %c0_i32_1 = arith.constant 0 : i32
    %c0_i32_2 = arith.constant 0 : i32
    return %arg0, %c0_i32, %c0_i32_0, %c0_i32_1 : i32, i32, i32, i32
  }
  func.func @transform_1(%arg0: i32) -> (i32, i32, i32) {
    %c0_i32 = arith.constant 0 : i32
    %c0_i32_0 = arith.constant 0 : i32
    %c0_i32_1 = arith.constant 0 : i32
    %c0_i32_2 = arith.constant 0 : i32
    return %c0_i32, %c0_i32_0, %c0_i32_1 : i32, i32, i32
  }
  func.func @transform_2(%arg0: i32) -> (i32, i32, i32) {
    %c0_i32 = arith.constant 0 : i32
    %c0_i32_0 = arith.constant 0 : i32
    %c0_i32_1 = arith.constant 0 : i32
    %c0_i32_2 = arith.constant 0 : i32
    return %c0_i32, %c0_i32_0, %c0_i32_1 : i32, i32, i32
  }
  func.func @transform_3(%arg0: i32) -> (i32, i32) {
    %c0_i32 = arith.constant 0 : i32
    %c0_i32_0 = arith.constant 0 : i32
    %c0_i32_1 = arith.constant 0 : i32
    return %c0_i32, %c0_i32_0 : i32, i32
  }
  func.func @transform_4(%arg0: i32) -> (i32, i32) {
    %c0_i32 = arith.constant 0 : i32
    %c0_i32_0 = arith.constant 0 : i32
    %c0_i32_1 = arith.constant 0 : i32
    return %c0_i32, %c0_i32_0 : i32, i32
  }
  func.func @transform_5(%arg0: i32) -> (i32, i32, i32) {
    %c0_i32 = arith.constant 0 : i32
    %c0_i32_0 = arith.constant 0 : i32
    %c0_i32_1 = arith.constant 0 : i32
    return %arg0, %c0_i32, %c0_i32_0 : i32, i32, i32
  }
}

</mosaic_0001>

<bundles_post_ra>
// kernel: tile.13
= control target key start
LH: loop header
LB: loop body
LE: loop exit
PB: predicated region body
PF: predicated region fallthrough
CT: control target
= control target key end

     0   :  { %s22_s0 = inlined_call_operand.vmem [shape: f32[8], index: 0, kind: input, shape index: {}]   ;;  %s23_s1 = inlined_call_operand.vmem [shape: f32[4,8], index: 1, kind: output, shape index: {}]  }
   0x1   :  { %v4_v0 = vld [vmem:[%s22_s0] ss:$0 sm:$0xff] }
   0x2   :  { %5 = vst [vmem:[%s23_s1] sm:$0xf] %v4_v0 }

// kernel: tile.14
= control target key start
LH: loop header
LB: loop body
LE: loop exit
PB: predicated region body
PF: predicated region fallthrough
CT: control target
= control target key end

     0   :  { %vm7_vm0 = vcmask 64512   ;;  %s37_s8 = smov 8   ;;  %s38_s9 = smov 16   ;;  %vm13_vm1 = vcmask 261312   ;;  %vm19_vm2 = vcmask 195712   ;;  %vm25_vm3 = vcmask 130112   ;;  %s55_s0 = inlined_call_operand.vmem [shape: f32[4,8], index: 0, kind: input, shape index: {}]   ;;  %s56_s1 = inlined_call_operand.vmem [shape: f32[1,32], index: 1, kind: output, shape index: {}]  }
   0x1   :  { %v4_v0 = vld [vmem:[%s55_s0] sm:$0xf]  ;;  %s36_s0 = smov 24  }
   0x2   :  { %5 = vst [vmem:[#allocation1] sm:$0xf] %v4_v0 }
   0x9   :  { %v10_v1 = vld [vmem:[#allocation1 + $0x3] sm:$0x1]   ;;  %v22_v2 = vld [vmem:[#allocation1 + $0x1] sm:$0x1]   ;;  %v6_v3 = vld [vmem:[#allocation1] sm:$0x1]  }
   0xa   :  { %11 = vrot.lane.b32.xlu0 %v10_v1, %s36_s0  ;;  %23 = vrot.lane.b32.xlu1 %v22_v2, %s37_s8  ;;  %v16_v4 = vld [vmem:[#allocation1 + $0x2] sm:$0x1]   ;;  %8 = vst.msk [vmem:[#allocation0] sm:$0x1] %vm7_vm0, %v6_v3  }
   0xe   :  { %17 = vrot.lane.b32.xlu0 %v16_v4, %s38_s9 }
  0x7c   :  { %v12_v5 = vpop.permute.xlu0 %11   ;;  %v24_v6 = vpop.permute.xlu1 %23  }
  0x7d   :  { %14 = vst.msk [vmem:[#allocation0] sm:$0x1] %vm13_vm1, %v12_v5  }
  0x80   :  { %v18_v7 = vpop.permute.xlu0 %17  }
  0x81   :  { %20 = vst.msk [vmem:[#allocation0] sm:$0x1] %vm19_vm2, %v18_v7  }
  0x82   :  { %26 = vst.msk [vmem:[#allocation0] sm:$0x1] %vm25_vm3, %v24_v6  }
  0x89   :  { %v30_v8 = vld [vmem:[#allocation0] sm:$0x1] }
  0x8a   :  { %32 = vst [vmem:[%s56_s1] sm:$0x1] %v30_v8 }

// kernel: tile.18
= control target key start
LH: loop header
LB: loop body
LE: loop exit
PB: predicated region body
PF: predicated region fallthrough
CT: control target
= control target key end

     0   :  { %s22_s0 = inlined_call_operand.vmem [shape: f32[16], index: 0, kind: input, shape index: {}]   ;;  %s23_s1 = inlined_call_operand.vmem [shape: f32[2,16], index: 1, kind: output, shape index: {}]  }
   0x1   :  { %v4_v0 = vld [vmem:[%s22_s0] ss:$0 sm:$0xff] }
   0x2   :  { %5 = vst [vmem:[%s23_s1] sm:$0x3] %v4_v0 }

// kernel: tile.19
= control target key start
LH: loop header
LB: loop body
LE: loop exit
PB: predicated region body
PF: predicated region fallthrough
CT: control target
= control target key end

     0   :  { %vm7_vm0 = vcmask 130048   ;;  %vm13_vm1 = vcmask 261248   ;;  %s39_s0 = inlined_call_operand.vmem [shape: f32[2,16], index: 0, kind: input, shape index: {}]   ;;  %s40_s1 = inlined_call_operand.vmem [shape: f32[1,32], index: 1, kind: output, shape index: {}]  }
   0x1   :  { %v4_v0 = vld [vmem:[%s39_s0] sm:$0x3]  ;;  %s22_s0 = smov 16  }
   0x2   :  { %5 = vst [vmem:[#allocation1] sm:$0x3] %v4_v0 }
   0x9   :  { %v10_v1 = vld [vmem:[#allocation1 + $0x1] sm:$0x1]   ;;  %v6_v2 = vld [vmem:[#allocation1] sm:$0x1]  }
   0xa   :  { %11 = vrot.lane.b32.xlu0 %v10_v1, %s22_s0  ;;  %8 = vst.msk [vmem:[#allocation0] sm:$0x1] %vm7_vm0, %v6_v2  }
  0x7c   :  { %v12_v3 = vpop.permute.xlu0 %11  }
  0x7d   :  { %14 = vst.msk [vmem:[#allocation0] sm:$0x1] %vm13_vm1, %v12_v3  }
  0x84   :  { %v18_v4 = vld [vmem:[#allocation0] sm:$0x1] }
  0x85   :  { %20 = vst [vmem:[%s40_s1] sm:$0x1] %v18_v4 }

// kernel: feature_embedding.1
= control target key start
LH: loop header
LB: loop body
LE: loop exit
PB: predicated region body
PF: predicated region fallthrough
CT: control target
= control target key end

     0   :  { %s4434_s18 = smov 0   ;;  %s4945_s0 = inlined_call_operand.vmem [shape: bf16[8,8,3,16], index: 0, kind: input, shape index: {}]   ;;  %s4946_s1 = inlined_call_operand.vmem [shape: bf16[6,16,32], index: 1, kind: input, shape index: {}]   ;;  %s4947_s2 = inlined_call_operand.vmem [shape: bf16[3,32,32], index: 2, kind: input, shape index: {}]   ;;  %s4948_s3 = inlined_call_operand.vmem [shape: f32[1,32], index: 3, kind: input, shape index: {}]   ;;  %s4949_s4 = inlined_call_operand.vmem [shape: f32[1,32], index: 4, kind: input, shape index: {}]   ;;  %s4950_s5 = inlined_call_operand.vmem [shape: f32[8,2,32], index: 5, kind: output, shape index: {}]  }
   0x1 LB: > { %s3595_s19 = sadd.s32 4294967295, %s4399_s18   ;;  %p3599_p0 = scmp.ge.s32.totalorder %s4399_s18, 1  ;;  %s4399_s18 = sphi %s4434_s18, %s15_s18  }
   0x2   : > { %p189_p1 = scmp.lt.s32.totalorder %s4399_s18, 3 }
   0x4   : > { %p190_p2 = pnand %p3599_p0, %p189_p1 }
   0x5   : > { %v4344_v0 = vld [vmem:[%s4946_s1 + $0x8] sm:$0xff] (!%p190_p2)   ;;  %v686_v1 = vlaneseq (!%p190_p2)  ;;  %v4401_v2 = vmov (!%p190_p2), 0.0   ;;  %v4345_v3 = vld [vmem:[%s4946_s1] sm:$0xff] (!%p190_p2)   ;;  %vm4402_vm0 = vmmov (!%p190_p2), 0   ;;  %s3600_s24 = sshll.u32 (!%p190_p2), %s3595_s19, 2  ;;  %vm259_vm1 = vcmask (!%p190_p2), 130048  }
   0x6   : > { %193 = sbr.rel (%p190_p2) target bundleno = 1357 (0x54d), region = 40  ;;  %3949 = vmatprep.subr.bf16.mxu0 (!%p190_p2), %v4401_v2  ;;  %3955 = vmatprep.subr.bf16.mxu1 (!%p190_p2), %v4401_v2  ;;  %p219_p3 = scmp.lt.s32.totalorder (!%p190_p2), %s3600_s24, 7  ;;  %v4403_v4 = vmov (!%p190_p2), 1983009808   ;;  %v4346_v15 = vld [vmem:[%s4946_s1 + $0x10] sm:$0xff] (!%p190_p2)   ;;  %v4347_v20 = vld [vmem:[%s4946_s1 + $0x18] sm:$0xff] (!%p190_p2)  }
   0x7   : > { %3950 = vmatpush3.bf16.msra.mxu0 (!%p190_p2), %v4344_v0  ;;  %3951 = vmatprep.mubr.msk.bf16.mxu0 (!%p190_p2), %vm4402_vm0, %v4401_v2  ;;  %v684_v5 = vunpack.c.l.s4 (!%p190_p2), %v4403_v4  ;;  %v687_v6 = vshrl.u32 (!%p190_p2), %v686_v1, 7  ;;  %v4348_v23 = vld [vmem:[%s4946_s1 + $0x20] sm:$0xff] (!%p190_p2)   ;;  %v4349_v27 = vld [vmem:[%s4946_s1 + $0x28] sm:$0xff] (!%p190_p2)   ;;  %v4350_v31 = vld [vmem:[%s4947_s2 + $0x10] sm:$0xff] (!%p190_p2)   ;;  %vm232_vm2 = vcmask (!%p190_p2), 253952   ;;  %vm910_vm7 = vcmask (!%p190_p2), 261120  }
   0x8   : > { %3956 = vmatpush3.bf16.msra.mxu1 (!%p190_p2), %v4345_v3  ;;  %3957 = vmatprep.mubr.msk.bf16.mxu1 (!%p190_p2), %vm4402_vm0, %v4401_v2  ;;  %v4351_v32 = vld [vmem:[%s4947_s2 + $0x18] sm:$0xff] (!%p190_p2)   ;;  %vm233_vm3 = vsmask.f32 (!%p190_p2), 256  ;;  %v235_v33 = vld [vmem:[#allocation2] sm:$0x1] (!%p190_p2)  ;;  %v4356_v36 = vld [vmem:[%s4947_s2 + $0x8] sm:$0xff] (!%p190_p2)  }
   0x9   : > { %3961 = vmatprep.subr.bf16.mxu0 (!%p190_p2), %v4401_v2  ;;  %3967 = vmatprep.subr.bf16.mxu1 (!%p190_p2), %v4401_v2  ;;  %v685_v7 = vunpack.c.0.s8 (!%p190_p2), %v684_v5  ;;  %vm234_vm4 = vmand (!%p190_p2), %vm232_vm2, %vm233_vm3  ;;  %v4355_v35 = vld [vmem:[%s4947_s2] sm:$0xff] (!%p190_p2)   ;;  %vm882_vm8 = vcmask (!%p190_p2), 254976   ;;  %vm883_vm9 = vsmask.f32 (!%p190_p2), 1282 }
   0xa   : > { %v236_v34 = vsel (!%p190_p2), %vm234_vm4, 0, %v235_v33  ;;  %vm4569_vm10 = vmand (!%p190_p2), %vm882_vm8, %vm883_vm9 }
   0xb   : > { %v4459_v8 = vsub.s32 (!%p190_p2), %v685_v7, %v687_v6  ;;  %237 = vst [vmem:[#allocation2] sm:$0x1] (!%p190_p2), %v236_v34 }
   0xd   : > { %s4954_s24 = smov (!%p219_p3, %s3600_s24), 7 }
   0xe   : > { %s3816_s25 = sshll.u32 %s4954_s24, 4  ;;  %s3604_s29 = sshll.u32 %s4954_s24, 1 }
   0xf   : > { %s4464_s28 = scalar_lea.vmem %s4945_s0, %s3816_s25  ;;  %s4684_s7 = scalar_lea.vmem %s4950_s5, %s3604_s29 }
  0x10   : > { %v241_v9 = vld [vmem:[%s4464_s28 + $0x2] sm:$0x3]  ;;  %v240_v10 = vld [vmem:[%s4464_s28] sm:$0x3]  ;;  %v245_v13 = vld [vmem:[%s4464_s28 + $0xa] sm:$0x3] }
  0x11   : > { %3952 = vmatmul.mubr.msk.bf16.vlgmr.msra.gmra.mrb[0].mxu0 %vm259_vm1, %v241_v9  ;;  %3958 = vmatmul.mubr.msk.bf16.vlgmr.msra.gmra.mrb[0].mxu1 %vm259_vm1, %v240_v10  ;;  %v689_v11 = vrot.slane %v240_v10, %v4459_v8  ;;  %v244_v14 = vld [vmem:[%s4464_s28 + $0x8] sm:$0x3]  ;;  %v242_v18 = vld [vmem:[%s4464_s28 + $0x4] sm:$0x3]  ;;  %v246_v19 = vld [vmem:[%s4464_s28 + $0xc] sm:$0x3]  ;;  %v798_v24 = vrot.slane %v241_v9, %v4459_v8 }
  0x12   : > { %3962 = vmatpush3.bf16.msra.mxu0 %v4344_v0  ;;  %3968 = vmatpush3.bf16.msra.mxu1 %v4345_v3  ;;  %v243_v21 = vld [vmem:[%s4464_s28 + $0x6] sm:$0x3]  ;;  %v247_v22 = vld [vmem:[%s4464_s28 + $0xe] sm:$0x3] }
  0x13   : > { %v693_v12 = vshll.u32 %v689_v11, 16  ;;  %3963 = vmatprep.mubr.msk.bf16.mxu0 %vm4402_vm0, %v4401_v2  ;;  %3969 = vmatprep.mubr.msk.bf16.mxu1 %vm4402_vm0, %v4401_v2  ;;  %v691_v16 = vshrl.u32 %v689_v11, 16  ;;  %v802_v25 = vshll.u32 %v798_v24, 16  ;;  %v800_v28 = vshrl.u32 %v798_v24, 16 }
  0x14   : > { %3973 = vmatprep.subr.bf16.mxu0 %v4401_v2  ;;  %3979 = vmatprep.subr.bf16.mxu1 %v4401_v2 }
  0x15   : > { %v695_v17 = vrot.slane %v693_v12, 1  ;;  %v804_v29 = vrot.slane %v802_v25, 1 }
  0x17   : > { %v696_v26 = vor.u32 %v695_v17, %v691_v16  ;;  %v805_v30 = vor.u32 %v804_v29, %v800_v28 }
  0x19   : > { %3964 = vmatmul.mubr.msk.bf16.vlgmr.msra.gmra.mrb[4].mxu0 %vm259_vm1, %v245_v13  ;;  %3970 = vmatmul.mubr.msk.bf16.vlgmr.msra.gmra.mrb[4].mxu1 %vm259_vm1, %v244_v14 }
  0x1a   : > { %3974 = vmatpush3.bf16.msra.mxu0 %v4346_v15  ;;  %3980 = vmatpush3.bf16.msra.mxu1 %v4346_v15 }
  0x1b   : > { %3975 = vmatprep.mubr.msk.bf16.mxu0 %vm4402_vm0, %v4401_v2  ;;  %3981 = vmatprep.mubr.msk.bf16.mxu1 %vm4402_vm0, %v4401_v2 }
  0x1c   : > { %3985 = vmatprep.subr.bf16.mxu0 %v4401_v2  ;;  %3991 = vmatprep.subr.bf16.mxu1 %v4401_v2 }
  0x21   : > { %3976 = vmatmul.mubr.msk.bf16.vlgmr.msra.gmra.mrb[8].mxu0 %vm259_vm1, %v242_v18  ;;  %3982 = vmatmul.mubr.msk.bf16.vlgmr.msra.gmra.mrb[8].mxu1 %vm259_vm1, %v246_v19 }
  0x22   : > { %3986 = vmatpush3.bf16.msra.mxu0 %v4347_v20  ;;  %3992 = vmatpush3.bf16.msra.mxu1 %v4347_v20 }
  0x23   : > { %3987 = vmatprep.mubr.msk.bf16.mxu0 %vm4402_vm0, %v4401_v2  ;;  %3993 = vmatprep.mubr.msk.bf16.mxu1 %vm4402_vm0, %v4401_v2 }
  0x24   : > { %3997 = vmatprep.subr.bf16.mxu0 %v4401_v2  ;;  %4003 = vmatprep.subr.bf16.mxu1 %v4401_v2 }
  0x29   : > { %3988 = vmatmul.mubr.msk.bf16.vlgmr.msra.gmra.mrb[12].mxu0 %vm259_vm1, %v243_v21  ;;  %3994 = vmatmul.mubr.msk.bf16.vlgmr.msra.gmra.mrb[12].mxu1 %vm259_vm1, %v247_v22 }
  0x2a   : > { %3998 = vmatpush3.bf16.msra.mxu0 %v4348_v23  ;;  %4004 = vmatpush3.bf16.msra.mxu1 %v4348_v23  ;;  %v4553_v23 = vld [vmem:[%s4948_s3] ss:$0 sm:$0xff] }
  0x2b   : > { %3999 = vmatprep.mubr.msk.bf16.mxu0 %vm4402_vm0, %v4401_v2  ;;  %4005 = vmatprep.mubr.msk.bf16.mxu1 %vm4402_vm0, %v4401_v2 }
  0x2c   : > { %4009 = vmatprep.subr.bf16.mxu0 %v4401_v2  ;;  %4015 = vmatprep.subr.bf16.mxu1 %v4401_v2 }
  0x31   : > { %4000 = vmatmul.mubr.msk.bf16.vlgmr.msra.gmra.mrb[16].mxu0 %vm259_vm1, %v244_v14  ;;  %4006 = vmatmul.mubr.msk.bf16.vlgmr.msra.gmra.mrb[16].mxu1 %vm259_vm1, %v696_v26 }
  0x32   : > { %4010 = vmatpush3.bf16.msra.mxu0 %v4349_v27  ;;  %4016 = vmatpush3.bf16.msra.mxu1 %v4349_v27 }
  0x33   : > { %4011 = vmatprep.mubr.msk.bf16.mxu0 %vm4402_vm0, %v4401_v2  ;;  %4017 = vmatprep.mubr.msk.bf16.mxu1 %vm4402_vm0, %v4401_v2 }
  0x34   : > { %4021 = vmatprep.subr.bf16.mxu0 %v4401_v2  ;;  %4029 = vmatprep.subr.bf16.mxu1 %v4401_v2 }
  0x39   : > { %4012 = vmatmul.mubr.msk.bf16.vlgmr.msra.gmra.mrb[20].mxu0 %vm259_vm1, %v245_v13  ;;  %4018 = vmatmul.mubr.msk.bf16.vlgmr.msra.gmra.mrb[20].mxu1 %vm259_vm1, %v805_v30 }
  0x3a   : > { %4025 = vmatprep.mubr.msk.bf16.mxu0 %vm4402_vm0, %v4401_v2  ;;  %4033 = vmatprep.mubr.msk.bf16.mxu1 %vm4402_vm0, %v4401_v2 }
  0x3b   : > { %4022 = vmatpush3.bf16.msra.mxu0 %v4350_v31  ;;  %4030 = vmatpush3.bf16.msra.mxu1 %v4355_v35 }
  0x3c   : > { %4023 = vmatprep.subr.bf16.mxu0 %v4401_v2  ;;  %4031 = vmatprep.subr.bf16.mxu1 %v4401_v2 }
  0x3f   : > { %4024 = vmatpush3.bf16.msra.mxu0 %v4351_v32  ;;  %4032 = vmatpush3.bf16.msra.mxu1 %v4356_v36 }
  0x40   : > { %4037 = vmatprep.subr.bf16.mxu0 %v4401_v2  ;;  %4045 = vmatprep.subr.bf16.mxu1 %v4401_v2 }
  0xe4   : > { %v297_v37 = vpop.f32.mrb[0].mxu0  ;;  %v346_v38 = vpop.f32.mrb[0].mxu1 }
  0xe5   : > { %v347_v39 = vadd.f32 %v346_v38, %v297_v37  ;;  %v3953_v40 = vpop.f32.mrb[1].mxu0  ;;  %v3959_v41 = vpop.f32.mrb[1].mxu1 }
  0xe6   : > { %v300_v42 = vpop.f32.mrb[2].mxu0  ;;  %v349_v43 = vpop.f32.mrb[2].mxu1  ;;  %v4352_v40 = vld [vmem:[%s4947_s2 + $0x20] sm:$0xff]  }
  0xe7   : > { %v3954_v44 = vpop.f32.mrb[3].mxu0  ;;  %v3960_v45 = vpop.f32.mrb[3].mxu1 }
  0xe8   : > { %v4353_v44 = vld [vmem:[%s4947_s2 + $0x28] sm:$0xff]  }
  0xec   : > { %v389_v46 = vpop.f32.mrb[4].mxu0  ;;  %v432_v47 = vpop.f32.mrb[4].mxu1 }
  0xed   : > { %v433_v48 = vadd.f32 %v432_v47, %v389_v46  ;;  %v3965_v49 = vpop.f32.mrb[5].mxu0  ;;  %v3971_v50 = vpop.f32.mrb[5].mxu1 }
  0xee   : > { %v392_v51 = vpop.f32.mrb[6].mxu0  ;;  %v435_v52 = vpop.f32.mrb[6].mxu1  ;;  %v885_v49 = vld [vmem:[#allocation2] sm:$0x3] }
  0xef   : > { %v3966_v53 = vpop.f32.mrb[7].mxu0  ;;  %v3972_v54 = vpop.f32.mrb[7].mxu1  ;;  %v4354_v50 = vld [vmem:[%s4946_s1] sm:$0xff]  }
  0xf0   : > { %v3652_v53 = vld [vmem:[%s4464_s28 + $0x10] sm:$0x3]  ;;  %v4357_v54 = vld [vmem:[%s4946_s1 + $0x8] sm:$0xff]  }
  0xf4   : > { %v484_v55 = vpop.f32.mrb[8].mxu0  ;;  %v528_v56 = vpop.f32.mrb[8].mxu1 }
  0xf5   : > { %v490_v57 = vadd.f32 %v484_v55, %v347_v39  ;;  %v534_v58 = vadd.f32 %v528_v56, %v433_v48  ;;  %v3977_v59 = vpop.f32.mrb[9].mxu0  ;;  %v3983_v60 = vpop.f32.mrb[9].mxu1  ;;  %v3656_v56 = vld [vmem:[%s4464_s28 + $0x18] sm:$0x3] }
  0xf6   : > { %v487_v61 = vpop.f32.mrb[10].mxu0  ;;  %v531_v62 = vpop.f32.mrb[10].mxu1  ;;  %v3658_v59 = vld [vmem:[%s4464_s28 + $0x1c] sm:$0x3] }
  0xf7   : > { %v3978_v63 = vpop.f32.mrb[11].mxu0  ;;  %v3984_v0 = vpop.f32.mrb[11].mxu1  ;;  %v4359_v60 = vld [vmem:[%s4946_s1 + $0x18] sm:$0xff]   ;;  %v1527_v62 = vrot.slane %v3652_v53, %v4459_v8 }
  0xf8   : > { %v3657_v61 = vld [vmem:[%s4464_s28 + $0x1a] sm:$0x3]  ;;  %v3659_v0 = vld [vmem:[%s4464_s28 + $0x1e] sm:$0x3] }
  0xf9   : > { %v1531_v63 = vshll.u32 %v1527_v62, 16 }
  0xfc   : > { %v581_v1 = vpop.f32.mrb[12].mxu0  ;;  %v625_v3 = vpop.f32.mrb[12].mxu1 }
  0xfd   : > { %v587_v4 = vadd.f32 %v581_v1, %v490_v57  ;;  %v631_v5 = vadd.f32 %v625_v3, %v534_v58  ;;  %v3989_v6 = vpop.f32.mrb[13].mxu0  ;;  %v3995_v7 = vpop.f32.mrb[13].mxu1  ;;  %v4358_v57 = vld [vmem:[%s4946_s1 + $0x10] sm:$0xff]   ;;  %v4360_v1 = vld [vmem:[%s4946_s1 + $0x20] sm:$0xff]  }
  0xfe   : > { %v584_v9 = vpop.f32.mrb[14].mxu0  ;;  %v628_v10 = vpop.f32.mrb[14].mxu1  ;;  %v3653_v58 = vld [vmem:[%s4464_s28 + $0x12] sm:$0x3]  ;;  %v3654_v3 = vld [vmem:[%s4464_s28 + $0x14] sm:$0x3] }
  0xff   : > { %v3990_v11 = vpop.f32.mrb[15].mxu0  ;;  %v3996_v12 = vpop.f32.mrb[15].mxu1  ;;  %v1635_v6 = vrot.slane %v3653_v58, %v4459_v8  ;;  %v4361_v10 = vld [vmem:[%s4946_s1 + $0x28] sm:$0xff]  }
 0x100   : > { %v3655_v11 = vld [vmem:[%s4464_s28 + $0x16] sm:$0x3] }
 0x101   : > { %v1639_v9 = vshll.u32 %v1635_v6, 16  ;;  %v1637_v12 = vshrl.u32 %v1635_v6, 16 }
 0x104   : > { %v675_v13 = vpop.f32.mrb[16].mxu0  ;;  %v734_v14 = vpop.f32.mrb[16].mxu1 }
 0x105   : > { %v681_v15 = vadd.f32 %v675_v13, %v587_v4  ;;  %v740_v16 = vadd.f32 %v734_v14, %v631_v5  ;;  %v4001_v17 = vpop.f32.mrb[17].mxu0  ;;  %v4007_v18 = vpop.f32.mrb[17].mxu1  ;;  %v1529_v4 = vshrl.u32 %v1527_v62, 16  ;;  %v1533_v5 = vrot.slane %v1531_v63, 1 }
 0x106   : > { %v678_v19 = vpop.f32.mrb[18].mxu0  ;;  %v737_v20 = vpop.f32.mrb[18].mxu1  ;;  %v1641_v13 = vrot.slane %v1639_v9, 1  ;;  %v4364_v17 = vld [vmem:[%s4947_s2] sm:$0xff]   ;;  %v4366_v18 = vld [vmem:[%s4947_s2 + $0x8] sm:$0xff]  }
 0x107   : > { %v4002_v21 = vpop.f32.mrb[19].mxu0  ;;  %v4008_v22 = vpop.f32.mrb[19].mxu1  ;;  %v1534_v7 = vor.u32 %v1533_v5, %v1529_v4 }
 0x108   : > { %v1642_v14 = vor.u32 %v1641_v13, %v1637_v12 }
 0x10c   : > { %v784_v24 = vpop.f32.mrb[20].mxu0  ;;  %v843_v25 = vpop.f32.mrb[20].mxu1 }
 0x10d   : > { %v790_v26 = vadd.f32 %v784_v24, %v681_v15  ;;  %v849_v27 = vadd.f32 %v843_v25, %v740_v16  ;;  %v4013_v28 = vpop.f32.mrb[21].mxu0  ;;  %v4019_v29 = vpop.f32.mrb[21].mxu1  ;;  %v4362_v15 = vld [vmem:[%s4947_s2 + $0x10] sm:$0xff]   ;;  %v4363_v16 = vld [vmem:[%s4947_s2 + $0x18] sm:$0xff]  }
 0x10e   : > { %v787_v30 = vpop.f32.mrb[22].mxu0  ;;  %v846_v31 = vpop.f32.mrb[22].mxu1 }
 0x10f   : > { %v856_v32 = vadd.f32 %v4553_v23, %v790_v26  ;;  %v857_v33 = vadd.f32 %v4553_v23, %v849_v27  ;;  %v4014_v34 = vpop.f32.mrb[23].mxu0  ;;  %v4020_v35 = vpop.f32.mrb[23].mxu1 }
 0x110   : > { %v4677_v34 = vld [vmem:[%s4949_s4] ss:$0 sm:$0xff] }
 0x111   : > { %vm858_vm5 = vcmp.ge.f32.partialorder %v856_v32, 0.0  ;;  %v859_v36 = vmul.f32 0.1, %v856_v32  ;;  %vm862_vm6 = vcmp.ge.f32.partialorder %v857_v33, 0.0  ;;  %v863_v37 = vmul.f32 0.1, %v857_v33 }
 0x113   : > { %v860_v38 = vsel %vm858_vm5, %v856_v32, %v859_v36  ;;  %v864_v39 = vsel %vm862_vm6, %v857_v33, %v863_v37 }
 0x114   : > { %v861_v41 = vpack.c.bf16 %v860_v38, %v860_v38  ;;  %v865_v42 = vpack.c.bf16 %v864_v39, %v864_v39 }
 0x116   : > { %v873_v43 = vrot.slane %v865_v42, %v4459_v8  ;;  %4026 = vmatmul.mubr.msk.bf16.vlgmr.msra.gmra.mrb[24].mxu0 %vm910_vm7, %v861_v41 }
 0x117   : > { %4038 = vmatpush3.bf16.msra.mxu0 %v4352_v40  ;;  %4041 = vmatprep.mubr.msk.bf16.mxu0 %vm4402_vm0, %v4401_v2 }
 0x118   : > { %v875_v45 = vshrl.u32 %v873_v43, 16  ;;  %4039 = vmatprep.subr.bf16.mxu0 %v4401_v2  ;;  %v878_v47 = vshll.u32 %v873_v43, 16 }
 0x11a   : > { %v877_v46 = vrot.slane %v875_v45, 7 }
 0x11b   : > { %4040 = vmatpush3.bf16.msra.mxu0 %v4353_v44 }
 0x11c   : > { %v880_v51 = vor.u32 %v878_v47, %v877_v46  ;;  %4051 = vmatprep.subr.bf16.mxu0 %v4401_v2 }
 0x11e   : > { %v886_v52 = vsel %vm4569_vm10, %v880_v51, %v885_v49  ;;  %4042 = vmatmul.mubr.msk.bf16.vlgmr.msra.gmra.mrb[28].mxu0 %vm910_vm7, %v865_v42 }
 0x11f   : > { %887 = vst [vmem:[#allocation2] sm:$0x3] %v886_v52  ;;  %4052 = vmatpush3.bf16.msra.mxu0 %v4354_v50  ;;  %4053 = vmatprep.mubr.msk.bf16.mxu0 %vm4402_vm0, %v4401_v2 }
 0x120   : > { %4063 = vmatprep.subr.bf16.mxu0 %v4401_v2 }
 0x126   : > { %4054 = vmatmul.mubr.msk.bf16.vlgmr.msra.gmra.mrb[32].mxu0 %vm259_vm1, %v3652_v53  ;;  %v888_v55 = vld [vmem:[#allocation2] sm:$0x1] }
 0x127   : > { %4064 = vmatpush3.bf16.msra.mxu0 %v4354_v50  ;;  %4034 = vmatmul.mubr.msk.bf16.vlgmr.msra.gmra.mrb[24].mxu1 %vm910_vm7, %v888_v55 }
 0x128   : > { %4046 = vmatpush3.bf16.msra.mxu1 %v4357_v54  ;;  %4065 = vmatprep.mubr.msk.bf16.mxu0 %vm4402_vm0, %v4401_v2 }
 0x129   : > { %4075 = vmatprep.subr.bf16.mxu0 %v4401_v2  ;;  %4047 = vmatprep.mubr.msk.bf16.mxu1 %vm4402_vm0, %v4401_v2 }
 0x12a   : > { %4057 = vmatprep.subr.bf16.mxu1 %v4401_v2 }
 0x12e   : > { %4066 = vmatmul.mubr.msk.bf16.vlgmr.msra.gmra.mrb[36].mxu0 %vm259_vm1, %v3656_v56 }
 0x12f   : > { %4076 = vmatpush3.bf16.msra.mxu0 %v4358_v57  ;;  %4048 = vmatmul.mubr.msk.bf16.vlgmr.msra.gmra.mrb[28].mxu1 %vm259_vm1, %v3653_v58 }
 0x130   : > { %4058 = vmatpush3.bf16.msra.mxu1 %v4357_v54  ;;  %4077 = vmatprep.mubr.msk.bf16.mxu0 %vm4402_vm0, %v4401_v2 }
 0x131   : > { %4087 = vmatprep.subr.bf16.mxu0 %v4401_v2  ;;  %4059 = vmatprep.mubr.msk.bf16.mxu1 %vm4402_vm0, %v4401_v2 }
 0x132   : > { %4069 = vmatprep.subr.bf16.mxu1 %v4401_v2 }
 0x136   : > { %4078 = vmatmul.mubr.msk.bf16.vlgmr.msra.gmra.mrb[40].mxu0 %vm259_vm1, %v3658_v59 }
 0x137   : > { %4088 = vmatpush3.bf16.msra.mxu0 %v4359_v60  ;;  %4060 = vmatmul.mubr.msk.bf16.vlgmr.msra.gmra.mrb[32].mxu1 %vm259_vm1, %v3657_v61 }
 0x138   : > { %4070 = vmatpush3.bf16.msra.mxu1 %v4358_v57  ;;  %4089 = vmatprep.mubr.msk.bf16.mxu0 %vm4402_vm0, %v4401_v2 }
 0x139   : > { %4099 = vmatprep.subr.bf16.mxu0 %v4401_v2  ;;  %4071 = vmatprep.mubr.msk.bf16.mxu1 %vm4402_vm0, %v4401_v2 }
 0x13a   : > { %4081 = vmatprep.subr.bf16.mxu1 %v4401_v2 }
 0x13e   : > { %4090 = vmatmul.mubr.msk.bf16.vlgmr.msra.gmra.mrb[44].mxu0 %vm259_vm1, %v3659_v0 }
 0x13f   : > { %4100 = vmatpush3.bf16.msra.mxu0 %v4360_v1  ;;  %4072 = vmatmul.mubr.msk.bf16.vlgmr.msra.gmra.mrb[36].mxu1 %vm259_vm1, %v3654_v3 }
 0x140   : > { %4082 = vmatpush3.bf16.msra.mxu1 %v4359_v60  ;;  %4101 = vmatprep.mubr.msk.bf16.mxu0 %vm4402_vm0, %v4401_v2 }
 0x141   : > { %4111 = vmatprep.subr.bf16.mxu0 %v4401_v2  ;;  %4083 = vmatprep.mubr.msk.bf16.mxu1 %vm4402_vm0, %v4401_v2 }
 0x142   : > { %4093 = vmatprep.subr.bf16.mxu1 %v4401_v2 }
 0x146   : > { %4102 = vmatmul.mubr.msk.bf16.vlgmr.msra.gmra.mrb[48].mxu0 %vm259_vm1, %v1534_v7 }
 0x147   : > { %4112 = vmatpush3.bf16.msra.mxu0 %v4361_v10  ;;  %4084 = vmatmul.mubr.msk.bf16.vlgmr.msra.gmra.mrb[40].mxu1 %vm259_vm1, %v3655_v11 }
 0x148   : > { %4094 = vmatpush3.bf16.msra.mxu1 %v4360_v1  ;;  %4113 = vmatprep.mubr.msk.bf16.mxu0 %vm4402_vm0, %v4401_v2 }
 0x149   : > { %4095 = vmatprep.mubr.msk.bf16.mxu1 %vm4402_vm0, %v4401_v2  ;;  %4105 = vmatprep.subr.bf16.mxu1 %v4401_v2 }
 0x14a   : > { %4125 = vmatprep.subr.bf16.mxu0 %v4401_v2 }
 0x14e   : > { %4114 = vmatmul.mubr.msk.bf16.vlgmr.msra.gmra.mrb[52].mxu0 %vm259_vm1, %v1642_v14 }
 0x14f   : > { %4096 = vmatmul.mubr.msk.bf16.vlgmr.msra.gmra.mrb[44].mxu1 %vm259_vm1, %v3656_v56  ;;  %4129 = vmatprep.mubr.msk.bf16.mxu0 %vm4402_vm0, %v4401_v2 }
 0x150   : > { %4106 = vmatpush3.bf16.msra.mxu1 %v4361_v10  ;;  %4107 = vmatprep.mubr.msk.bf16.mxu1 %vm4402_vm0, %v4401_v2 }
 0x151   : > { %4117 = vmatprep.subr.bf16.mxu1 %v4401_v2  ;;  %4126 = vmatpush3.bf16.msra.mxu0 %v4364_v17 }
 0x152   : > { %4127 = vmatprep.subr.bf16.mxu0 %v4401_v2 }
 0x155   : > { %4128 = vmatpush3.bf16.msra.mxu0 %v4366_v18 }
 0x156   : > { %4141 = vmatprep.subr.bf16.mxu0 %v4401_v2 }
 0x157   : > { %4108 = vmatmul.mubr.msk.bf16.vlgmr.msra.gmra.mrb[48].mxu1 %vm259_vm1, %v3657_v61 }
 0x158   : > { %4121 = vmatprep.mubr.msk.bf16.mxu1 %vm4402_vm0, %v4401_v2  ;;  %4118 = vmatpush3.bf16.msra.mxu1 %v4362_v15 }
 0x159   : > { %4119 = vmatprep.subr.bf16.mxu1 %v4401_v2 }
 0x15c   : > { %4120 = vmatpush3.bf16.msra.mxu1 %v4363_v16 }
 0x15d   : > { %4133 = vmatprep.subr.bf16.mxu1 %v4401_v2 }
 0x1e9   : > { %v948_v19 = vpop.f32.mrb[24].mxu0 }
 0x1ea   : > { %v4027_v20 = vpop.f32.mrb[25].mxu0 }
 0x1eb   : > { %v951_v21 = vpop.f32.mrb[26].mxu0 }
 0x1ec   : > { %v4028_v22 = vpop.f32.mrb[27].mxu0 }
 0x1f1   : > { %v1063_v24 = vpop.f32.mrb[28].mxu0 }
 0x1f2   : > { %v4043_v25 = vpop.f32.mrb[29].mxu0 }
 0x1f3   : > { %v1066_v26 = vpop.f32.mrb[30].mxu0 }
 0x1f4   : > { %v4044_v27 = vpop.f32.mrb[31].mxu0 }
 0x1f9   : > { %v1187_v28 = vpop.f32.mrb[32].mxu0 }
 0x1fa   : > { %v1003_v29 = vpop.f32.mrb[24].mxu1  ;;  %v4055_v30 = vpop.f32.mrb[33].mxu0 }
 0x1fb   : > { %v1004_v31 = vadd.f32 %v1003_v29, %v948_v19  ;;  %v4035_v32 = vpop.f32.mrb[25].mxu1  ;;  %v1190_v33 = vpop.f32.mrb[34].mxu0 }
 0x1fc   : > { %v1006_v35 = vpop.f32.mrb[26].mxu1  ;;  %v4056_v36 = vpop.f32.mrb[35].mxu0 }
 0x1fd   : > { %v1069_v37 = vadd.f32 %v1063_v24, %v1004_v31  ;;  %v4036_v38 = vpop.f32.mrb[27].mxu1 }
 0x1ff   : > { %v1076_v39 = vadd.f32 %v4677_v34, %v1069_v37 }
 0x201   : > { %vm1077_vm11 = vcmp.ge.f32.partialorder %v1076_v39, 0.0  ;;  %v1078_v40 = vmul.f32 0.1, %v1076_v39  ;;  %v1273_v41 = vpop.f32.mrb[36].mxu0 }
 0x202   : > { %v1138_v42 = vpop.f32.mrb[28].mxu1  ;;  %v4067_v43 = vpop.f32.mrb[37].mxu0 }
 0x203   : > { %v1079_v44 = vsel %vm1077_vm11, %v1076_v39, %v1078_v40  ;;  %v1188_v45 = vadd.f32 %v1187_v28, %v1138_v42  ;;  %v4049_v46 = vpop.f32.mrb[29].mxu1  ;;  %v1276_v47 = vpop.f32.mrb[38].mxu0 }
 0x204   : > { %1081 = vst.msk [vmem:[%s4684_s7] sm:$0x3] %vm882_vm8, %v1079_v44  ;;  %v1141_v49 = vpop.f32.mrb[30].mxu1  ;;  %v4068_v50 = vpop.f32.mrb[39].mxu0 }
 0x205   : > { %v4050_v51 = vpop.f32.mrb[31].mxu1  ;;  %v4365_v50 = vld [vmem:[%s4947_s2 + $0x20] sm:$0xff]  }
 0x206   : > { %v1713_v51 = vld [vmem:[#allocation2] sm:$0x3] }
 0x209   : > { %v1368_v52 = vpop.f32.mrb[40].mxu0 }
 0x20a   : > { %v1230_v53 = vpop.f32.mrb[32].mxu1  ;;  %v4079_v54 = vpop.f32.mrb[41].mxu0 }
 0x20b   : > { %v1274_v55 = vadd.f32 %v1273_v41, %v1230_v53  ;;  %v4061_v56 = vpop.f32.mrb[33].mxu1  ;;  %v1371_v57 = vpop.f32.mrb[42].mxu0  ;;  %v4367_v54 = vld [vmem:[%s4947_s2 + $0x28] sm:$0xff]  }
 0x20c   : > { %v1233_v58 = vpop.f32.mrb[34].mxu1  ;;  %v4080_v59 = vpop.f32.mrb[43].mxu0  ;;  %v4369_v56 = vld [vmem:[%s4946_s1] sm:$0xff]  }
 0x20d   : > { %v4062_v60 = vpop.f32.mrb[35].mxu1  ;;  %v1374_v61 = vadd.f32 %v1368_v52, %v1274_v55  ;;  %v4368_v55 = vld [vmem:[%s4946_s1 + $0x8] sm:$0xff]   ;;  %v3707_v58 = vld [vmem:[%s4464_s28 + $0x22] sm:$0x3]  ;;  %v3706_v59 = vld [vmem:[%s4464_s28 + $0x20] sm:$0x3] }
 0x20e   : > { %v3711_v60 = vld [vmem:[%s4464_s28 + $0x2a] sm:$0x3] }
 0x211   : > { %v1464_v62 = vpop.f32.mrb[44].mxu0 }
 0x212   : > { %v1470_v63 = vadd.f32 %v1464_v62, %v1374_v61  ;;  %v1324_v0 = vpop.f32.mrb[36].mxu1  ;;  %v4091_v1 = vpop.f32.mrb[45].mxu0  ;;  %v3710_v61 = vld [vmem:[%s4464_s28 + $0x28] sm:$0x3]  ;;  %v4370_v62 = vld [vmem:[%s4946_s1 + $0x10] sm:$0xff]  }
 0x213   : > { %v1330_v3 = vadd.f32 %v1324_v0, %v1188_v45  ;;  %v4073_v4 = vpop.f32.mrb[37].mxu1  ;;  %v1467_v5 = vpop.f32.mrb[46].mxu0  ;;  %v3712_v0 = vld [vmem:[%s4464_s28 + $0x2c] sm:$0x3]  ;;  %v4371_v1 = vld [vmem:[%s4946_s1 + $0x18] sm:$0xff]  }
 0x214   : > { %v1327_v6 = vpop.f32.mrb[38].mxu1  ;;  %v4092_v7 = vpop.f32.mrb[47].mxu0  ;;  %v3709_v5 = vld [vmem:[%s4464_s28 + $0x26] sm:$0x3] }
 0x215   : > { %v4074_v9 = vpop.f32.mrb[39].mxu1  ;;  %v3713_v6 = vld [vmem:[%s4464_s28 + $0x2e] sm:$0x3]  ;;  %v4372_v7 = vld [vmem:[%s4946_s1 + $0x20] sm:$0xff]  }
 0x216   : > { %v2454_v9 = vrot.slane %v3707_v58, %v4459_v8 }
 0x219   : > { %v1572_v10 = vpop.f32.mrb[48].mxu0 }
 0x21a   : > { %v1578_v11 = vadd.f32 %v1572_v10, %v1470_v63  ;;  %v1420_v12 = vpop.f32.mrb[40].mxu1  ;;  %v4103_v13 = vpop.f32.mrb[49].mxu0  ;;  %v3708_v63 = vld [vmem:[%s4464_s28 + $0x24] sm:$0x3] }
 0x21b   : > { %v1426_v14 = vadd.f32 %v1420_v12, %v1330_v3  ;;  %v4085_v15 = vpop.f32.mrb[41].mxu1  ;;  %v1575_v16 = vpop.f32.mrb[50].mxu0  ;;  %v2346_v3 = vrot.slane %v3706_v59, %v4459_v8  ;;  %v2458_v12 = vshll.u32 %v2454_v9, 16 }
 0x21c   : > { %v1423_v17 = vpop.f32.mrb[42].mxu1  ;;  %v4104_v18 = vpop.f32.mrb[51].mxu0  ;;  %v2456_v15 = vshrl.u32 %v2454_v9, 16 }
 0x21d   : > { %v4086_v19 = vpop.f32.mrb[43].mxu1  ;;  %v2350_v4 = vshll.u32 %v2346_v3, 16  ;;  %v2348_v10 = vshrl.u32 %v2346_v3, 16  ;;  %v2460_v16 = vrot.slane %v2458_v12, 1  ;;  %v4374_v18 = vld [vmem:[%s4947_s2 + $0x10] sm:$0xff]  }
 0x21e   : > { %v4375_v19 = vld [vmem:[%s4947_s2 + $0x18] sm:$0xff]  }
 0x21f   : > { %v2461_v17 = vor.u32 %v2460_v16, %v2456_v15 }
 0x221   : > { %v1680_v20 = vpop.f32.mrb[52].mxu0 }
 0x222   : > { %v1686_v21 = vadd.f32 %v1680_v20, %v1578_v11  ;;  %v1513_v22 = vpop.f32.mrb[44].mxu1  ;;  %v4115_v24 = vpop.f32.mrb[53].mxu0  ;;  %v2352_v11 = vrot.slane %v2350_v4, 1  ;;  %v4379_v20 = vld [vmem:[%s4947_s2] sm:$0xff]  }
 0x223   : > { %v1519_v25 = vadd.f32 %v1513_v22, %v1426_v14  ;;  %v4097_v26 = vpop.f32.mrb[45].mxu1  ;;  %v1683_v27 = vpop.f32.mrb[54].mxu0  ;;  %v4373_v14 = vld [vmem:[%s4946_s1 + $0x28] sm:$0xff]  }
 0x224   : > { %v1688_v28 = vadd.f32 %v4553_v23, %v1686_v21  ;;  %v1516_v29 = vpop.f32.mrb[46].mxu1  ;;  %v4116_v30 = vpop.f32.mrb[55].mxu0  ;;  %v2353_v13 = vor.u32 %v2352_v11, %v2348_v10  ;;  %v4380_v21 = vld [vmem:[%s4947_s2 + $0x8] sm:$0xff]  }
 0x225   : > { %v4098_v31 = vpop.f32.mrb[47].mxu1 }
 0x226   : > { %vm1693_vm12 = vcmp.ge.f32.partialorder %v1688_v28, 0.0  ;;  %v1694_v32 = vmul.f32 0.1, %v1688_v28 }
 0x228   : > { %v1695_v33 = vsel %vm1693_vm12, %v1688_v28, %v1694_v32 }
 0x229   : > { %v1696_v35 = vpack.c.bf16 %v1695_v33, %v1695_v33 }
 0x22a   : > { %v1621_v36 = vpop.f32.mrb[48].mxu1 }
 0x22b   : > { %v1704_v37 = vrot.slane %v1696_v35, %v4459_v8  ;;  %v1627_v38 = vadd.f32 %v1621_v36, %v1519_v25  ;;  %v4109_v39 = vpop.f32.mrb[49].mxu1 }
 0x22c   : > { %v1624_v40 = vpop.f32.mrb[50].mxu1 }
 0x22d   : > { %v1706_v41 = vshrl.u32 %v1704_v37, 16  ;;  %v1687_v42 = vadd.f32 %v4553_v23, %v1627_v38  ;;  %v4110_v43 = vpop.f32.mrb[51].mxu1  ;;  %v1709_v45 = vshll.u32 %v1704_v37, 16 }
 0x22f   : > { %v1708_v44 = vrot.slane %v1706_v41, 7  ;;  %vm1689_vm13 = vcmp.ge.f32.partialorder %v1687_v42, 0.0  ;;  %v1690_v46 = vmul.f32 0.1, %v1687_v42 }
 0x231   : > { %v1711_v47 = vor.u32 %v1709_v45, %v1708_v44  ;;  %v1691_v49 = vsel %vm1689_vm13, %v1687_v42, %v1690_v46 }
 0x232   : > { %v1692_v52 = vpack.c.bf16 %v1691_v49, %v1691_v49 }
 0x233   : > { %v1714_v53 = vsel %vm4569_vm10, %v1711_v47, %v1713_v51 }
 0x234   : > { %1715 = vst [vmem:[#allocation2] sm:$0x3] %v1714_v53  ;;  %4122 = vmatmul.mubr.msk.bf16.vlgmr.msra.gmra.mrb[52].mxu1 %vm910_vm7, %v1692_v52 }
 0x235   : > { %4134 = vmatpush3.bf16.msra.mxu1 %v4365_v50  ;;  %4137 = vmatprep.mubr.msk.bf16.mxu1 %vm4402_vm0, %v4401_v2 }
 0x236   : > { %4135 = vmatprep.subr.bf16.mxu1 %v4401_v2 }
 0x239   : > { %4136 = vmatpush3.bf16.msra.mxu1 %v4367_v54 }
 0x23a   : > { %4147 = vmatprep.subr.bf16.mxu1 %v4401_v2 }
 0x23b   : > { %v1716_v57 = vld [vmem:[#allocation2] sm:$0x1] }
 0x23c   : > { %4130 = vmatmul.mubr.msk.bf16.vlgmr.msra.gmra.mrb[56].mxu0 %vm910_vm7, %v1716_v57  ;;  %4138 = vmatmul.mubr.msk.bf16.vlgmr.msra.gmra.mrb[56].mxu1 %vm910_vm7, %v1696_v35 }
 0x23d   : > { %4142 = vmatpush3.bf16.msra.mxu0 %v4368_v55  ;;  %4148 = vmatpush3.bf16.msra.mxu1 %v4369_v56 }
 0x23e   : > { %4143 = vmatprep.mubr.msk.bf16.mxu0 %vm4402_vm0, %v4401_v2  ;;  %4149 = vmatprep.mubr.msk.bf16.mxu1 %vm4402_vm0, %v4401_v2 }
 0x23f   : > { %4153 = vmatprep.subr.bf16.mxu0 %v4401_v2  ;;  %4159 = vmatprep.subr.bf16.mxu1 %v4401_v2 }
 0x244   : > { %4144 = vmatmul.mubr.msk.bf16.vlgmr.msra.gmra.mrb[60].mxu0 %vm259_vm1, %v3707_v58  ;;  %4150 = vmatmul.mubr.msk.bf16.vlgmr.msra.gmra.mrb[60].mxu1 %vm259_vm1, %v3706_v59 }
 0x245   : > { %4154 = vmatpush3.bf16.msra.mxu0 %v4368_v55  ;;  %4160 = vmatpush3.bf16.msra.mxu1 %v4369_v56 }
 0x246   : > { %4155 = vmatprep.mubr.msk.bf16.mxu0 %vm4402_vm0, %v4401_v2  ;;  %4161 = vmatprep.mubr.msk.bf16.mxu1 %vm4402_vm0, %v4401_v2 }
 0x247   : > { %4165 = vmatprep.subr.bf16.mxu0 %v4401_v2  ;;  %4171 = vmatprep.subr.bf16.mxu1 %v4401_v2 }
 0x24c   : > { %4156 = vmatmul.mubr.msk.bf16.vlgmr.msra.gmra.mrb[64].mxu0 %vm259_vm1, %v3711_v60  ;;  %4162 = vmatmul.mubr.msk.bf16.vlgmr.msra.gmra.mrb[64].mxu1 %vm259_vm1, %v3710_v61 }
 0x24d   : > { %4166 = vmatpush3.bf16.msra.mxu0 %v4370_v62  ;;  %4172 = vmatpush3.bf16.msra.mxu1 %v4370_v62 }
 0x24e   : > { %4167 = vmatprep.mubr.msk.bf16.mxu0 %vm4402_vm0, %v4401_v2  ;;  %4173 = vmatprep.mubr.msk.bf16.mxu1 %vm4402_vm0, %v4401_v2 }
 0x24f   : > { %4177 = vmatprep.subr.bf16.mxu0 %v4401_v2  ;;  %4183 = vmatprep.subr.bf16.mxu1 %v4401_v2 }
 0x254   : > { %4168 = vmatmul.mubr.msk.bf16.vlgmr.msra.gmra.mrb[68].mxu0 %vm259_vm1, %v3708_v63  ;;  %4174 = vmatmul.mubr.msk.bf16.vlgmr.msra.gmra.mrb[68].mxu1 %vm259_vm1, %v3712_v0 }
 0x255   : > { %4178 = vmatpush3.bf16.msra.mxu0 %v4371_v1  ;;  %4184 = vmatpush3.bf16.msra.mxu1 %v4371_v1 }
 0x256   : > { %4179 = vmatprep.mubr.msk.bf16.mxu0 %vm4402_vm0, %v4401_v2  ;;  %4185 = vmatprep.mubr.msk.bf16.mxu1 %vm4402_vm0, %v4401_v2 }
 0x257   : > { %4189 = vmatprep.subr.bf16.mxu0 %v4401_v2  ;;  %4195 = vmatprep.subr.bf16.mxu1 %v4401_v2 }
 0x25c   : > { %4180 = vmatmul.mubr.msk.bf16.vlgmr.msra.gmra.mrb[72].mxu0 %vm259_vm1, %v3709_v5  ;;  %4186 = vmatmul.mubr.msk.bf16.vlgmr.msra.gmra.mrb[72].mxu1 %vm259_vm1, %v3713_v6 }
 0x25d   : > { %4190 = vmatpush3.bf16.msra.mxu0 %v4372_v7  ;;  %4196 = vmatpush3.bf16.msra.mxu1 %v4372_v7 }
 0x25e   : > { %4191 = vmatprep.mubr.msk.bf16.mxu0 %vm4402_vm0, %v4401_v2  ;;  %4197 = vmatprep.mubr.msk.bf16.mxu1 %vm4402_vm0, %v4401_v2 }
 0x25f   : > { %4201 = vmatprep.subr.bf16.mxu0 %v4401_v2  ;;  %4207 = vmatprep.subr.bf16.mxu1 %v4401_v2 }
 0x264   : > { %4192 = vmatmul.mubr.msk.bf16.vlgmr.msra.gmra.mrb[76].mxu0 %vm259_vm1, %v3710_v61  ;;  %4198 = vmatmul.mubr.msk.bf16.vlgmr.msra.gmra.mrb[76].mxu1 %vm259_vm1, %v2353_v13 }
 0x265   : > { %4202 = vmatpush3.bf16.msra.mxu0 %v4373_v14  ;;  %4208 = vmatpush3.bf16.msra.mxu1 %v4373_v14 }
 0x266   : > { %4203 = vmatprep.mubr.msk.bf16.mxu0 %vm4402_vm0, %v4401_v2  ;;  %4209 = vmatprep.mubr.msk.bf16.mxu1 %vm4402_vm0, %v4401_v2 }
 0x267   : > { %4213 = vmatprep.subr.bf16.mxu0 %v4401_v2  ;;  %4221 = vmatprep.subr.bf16.mxu1 %v4401_v2 }
 0x26c   : > { %4204 = vmatmul.mubr.msk.bf16.vlgmr.msra.gmra.mrb[80].mxu0 %vm259_vm1, %v3711_v60  ;;  %4210 = vmatmul.mubr.msk.bf16.vlgmr.msra.gmra.mrb[80].mxu1 %vm259_vm1, %v2461_v17 }
 0x26d   : > { %4217 = vmatprep.mubr.msk.bf16.mxu0 %vm4402_vm0, %v4401_v2  ;;  %4225 = vmatprep.mubr.msk.bf16.mxu1 %vm4402_vm0, %v4401_v2 }
 0x26e   : > { %4214 = vmatpush3.bf16.msra.mxu0 %v4374_v18  ;;  %4222 = vmatpush3.bf16.msra.mxu1 %v4379_v20 }
 0x26f   : > { %4215 = vmatprep.subr.bf16.mxu0 %v4401_v2  ;;  %4223 = vmatprep.subr.bf16.mxu1 %v4401_v2 }
 0x272   : > { %4216 = vmatpush3.bf16.msra.mxu0 %v4375_v19  ;;  %4224 = vmatpush3.bf16.msra.mxu1 %v4380_v21 }
 0x273   : > { %4229 = vmatprep.subr.bf16.mxu0 %v4401_v2  ;;  %4237 = vmatprep.subr.bf16.mxu1 %v4401_v2 }
 0x307   : > { %v1774_v22 = vpop.f32.mrb[52].mxu1 }
 0x308   : > { %v4123_v24 = vpop.f32.mrb[53].mxu1 }
 0x309   : > { %v1777_v25 = vpop.f32.mrb[54].mxu1 }
 0x30a   : > { %v4124_v26 = vpop.f32.mrb[55].mxu1 }
 0x30f   : > { %v1829_v27 = vpop.f32.mrb[56].mxu0  ;;  %v1888_v28 = vpop.f32.mrb[56].mxu1 }
 0x310   : > { %v1830_v29 = vadd.f32 %v1829_v27, %v1774_v22  ;;  %v4131_v30 = vpop.f32.mrb[57].mxu0  ;;  %v4139_v31 = vpop.f32.mrb[57].mxu1 }
 0x311   : > { %v1832_v32 = vpop.f32.mrb[58].mxu0  ;;  %v1891_v33 = vpop.f32.mrb[58].mxu1 }
 0x312   : > { %v1894_v35 = vadd.f32 %v1888_v28, %v1830_v29  ;;  %v4132_v36 = vpop.f32.mrb[59].mxu0  ;;  %v4140_v37 = vpop.f32.mrb[59].mxu1 }
 0x314   : > { %v1895_v38 = vadd.f32 %v4677_v34, %v1894_v35 }
 0x316   : > { %vm1896_vm14 = vcmp.ge.f32.partialorder %v1895_v38, 0.0  ;;  %v1897_v39 = vmul.f32 0.1, %v1895_v38 }
 0x317   : > { %v1957_v40 = vpop.f32.mrb[60].mxu0  ;;  %v2006_v41 = vpop.f32.mrb[60].mxu1 }
 0x318   : > { %v1898_v42 = vsel %vm1896_vm14, %v1895_v38, %v1897_v39  ;;  %v2007_v43 = vadd.f32 %v2006_v41, %v1957_v40  ;;  %v4145_v44 = vpop.f32.mrb[61].mxu0  ;;  %v4151_v45 = vpop.f32.mrb[61].mxu1 }
 0x319   : > { %3705 = vst.msk [vmem:[%s4684_s7 + $0x2] sm:$0x3] %vm882_vm8, %v1898_v42  ;;  %v1960_v46 = vpop.f32.mrb[62].mxu0  ;;  %v2009_v47 = vpop.f32.mrb[62].mxu1 }
 0x31a   : > { %v4146_v49 = vpop.f32.mrb[63].mxu0  ;;  %v4152_v50 = vpop.f32.mrb[63].mxu1  ;;  %v4376_v46 = vld [vmem:[%s4947_s2 + $0x20] sm:$0xff]  }
 0x31f   : > { %v2049_v51 = vpop.f32.mrb[64].mxu0  ;;  %v2092_v52 = vpop.f32.mrb[64].mxu1 }
 0x320   : > { %v2093_v53 = vadd.f32 %v2092_v52, %v2049_v51  ;;  %v4157_v54 = vpop.f32.mrb[65].mxu0  ;;  %v4163_v55 = vpop.f32.mrb[65].mxu1 }
 0x321   : > { %v2052_v56 = vpop.f32.mrb[66].mxu0  ;;  %v2095_v57 = vpop.f32.mrb[66].mxu1  ;;  %v4378_v54 = vld [vmem:[%s4946_s1] sm:$0xff]  }
 0x322   : > { %v4158_v58 = vpop.f32.mrb[67].mxu0  ;;  %v4164_v59 = vpop.f32.mrb[67].mxu1  ;;  %v2532_v56 = vld [vmem:[#allocation2] sm:$0x3] }
 0x323   : > { %v3760_v58 = vld [vmem:[%s4464_s28 + $0x30] sm:$0x3]  ;;  %v4381_v59 = vld [vmem:[%s4946_s1 + $0x8] sm:$0xff]  }
 0x327   : > { %v2143_v60 = vpop.f32.mrb[68].mxu0  ;;  %v2187_v61 = vpop.f32.mrb[68].mxu1 }
 0x328   : > { %v2149_v62 = vadd.f32 %v2143_v60, %v2007_v43  ;;  %v2193_v63 = vadd.f32 %v2187_v61, %v2093_v53  ;;  %v4169_v0 = vpop.f32.mrb[69].mxu0  ;;  %v4175_v1 = vpop.f32.mrb[69].mxu1  ;;  %v3764_v61 = vld [vmem:[%s4464_s28 + $0x38] sm:$0x3] }
 0x329   : > { %v2146_v3 = vpop.f32.mrb[70].mxu0  ;;  %v2190_v4 = vpop.f32.mrb[70].mxu1  ;;  %v3766_v0 = vld [vmem:[%s4464_s28 + $0x3c] sm:$0x3] }
 0x32a   : > { %v4170_v5 = vpop.f32.mrb[71].mxu0  ;;  %v4176_v6 = vpop.f32.mrb[71].mxu1  ;;  %v4383_v1 = vld [vmem:[%s4946_s1 + $0x18] sm:$0xff]   ;;  %v3165_v4 = vrot.slane %v3760_v58, %v4459_v8 }
 0x32b   : > { %v3765_v3 = vld [vmem:[%s4464_s28 + $0x3a] sm:$0x3]  ;;  %v3767_v6 = vld [vmem:[%s4464_s28 + $0x3e] sm:$0x3] }
 0x32c   : > { %v3169_v5 = vshll.u32 %v3165_v4, 16 }
 0x32f   : > { %v2239_v7 = vpop.f32.mrb[72].mxu0  ;;  %v2283_v9 = vpop.f32.mrb[72].mxu1 }
 0x330   : > { %v2245_v10 = vadd.f32 %v2239_v7, %v2149_v62  ;;  %v2289_v11 = vadd.f32 %v2283_v9, %v2193_v63  ;;  %v4181_v12 = vpop.f32.mrb[73].mxu0  ;;  %v4187_v13 = vpop.f32.mrb[73].mxu1  ;;  %v4382_v62 = vld [vmem:[%s4946_s1 + $0x10] sm:$0xff]   ;;  %v4384_v7 = vld [vmem:[%s4946_s1 + $0x20] sm:$0xff]  }
 0x331   : > { %v2242_v14 = vpop.f32.mrb[74].mxu0  ;;  %v2286_v15 = vpop.f32.mrb[74].mxu1  ;;  %v3761_v63 = vld [vmem:[%s4464_s28 + $0x32] sm:$0x3]  ;;  %v3762_v9 = vld [vmem:[%s4464_s28 + $0x34] sm:$0x3] }
 0x332   : > { %v4182_v16 = vpop.f32.mrb[75].mxu0  ;;  %v4188_v17 = vpop.f32.mrb[75].mxu1  ;;  %v3273_v12 = vrot.slane %v3761_v63, %v4459_v8  ;;  %v4385_v15 = vld [vmem:[%s4946_s1 + $0x28] sm:$0xff]  }
 0x333   : > { %v3763_v16 = vld [vmem:[%s4464_s28 + $0x36] sm:$0x3] }
 0x334   : > { %v3277_v14 = vshll.u32 %v3273_v12, 16  ;;  %v3275_v17 = vshrl.u32 %v3273_v12, 16 }
 0x337   : > { %v2332_v18 = vpop.f32.mrb[76].mxu0  ;;  %v2391_v19 = vpop.f32.mrb[76].mxu1 }
 0x338   : > { %v2338_v20 = vadd.f32 %v2332_v18, %v2245_v10  ;;  %v2397_v21 = vadd.f32 %v2391_v19, %v2289_v11  ;;  %v4193_v22 = vpop.f32.mrb[77].mxu0  ;;  %v4199_v24 = vpop.f32.mrb[77].mxu1  ;;  %v3167_v10 = vshrl.u32 %v3165_v4, 16  ;;  %v3171_v11 = vrot.slane %v3169_v5, 1 }
 0x339   : > { %v2335_v25 = vpop.f32.mrb[78].mxu0  ;;  %v2394_v26 = vpop.f32.mrb[78].mxu1  ;;  %v3279_v18 = vrot.slane %v3277_v14, 1  ;;  %v4388_v22 = vld [vmem:[%s4947_s2] sm:$0xff]   ;;  %v4390_v24 = vld [vmem:[%s4947_s2 + $0x8] sm:$0xff]  }
 0x33a   : > { %v4194_v27 = vpop.f32.mrb[79].mxu0  ;;  %v4200_v28 = vpop.f32.mrb[79].mxu1  ;;  %v3172_v13 = vor.u32 %v3171_v11, %v3167_v10 }
 0x33b   : > { %v3280_v19 = vor.u32 %v3279_v18, %v3275_v17 }
 0x33f   : > { %v2440_v29 = vpop.f32.mrb[80].mxu0  ;;  %v2499_v30 = vpop.f32.mrb[80].mxu1 }
 0x340   : > { %v2446_v31 = vadd.f32 %v2440_v29, %v2338_v20  ;;  %v2505_v32 = vadd.f32 %v2499_v30, %v2397_v21  ;;  %v4205_v33 = vpop.f32.mrb[81].mxu0  ;;  %v4211_v35 = vpop.f32.mrb[81].mxu1  ;;  %v4386_v20 = vld [vmem:[%s4947_s2 + $0x10] sm:$0xff]   ;;  %v4387_v21 = vld [vmem:[%s4947_s2 + $0x18] sm:$0xff]  }
 0x341   : > { %v2443_v36 = vpop.f32.mrb[82].mxu0  ;;  %v2502_v37 = vpop.f32.mrb[82].mxu1 }
 0x342   : > { %v2506_v38 = vadd.f32 %v4553_v23, %v2446_v31  ;;  %v2507_v39 = vadd.f32 %v4553_v23, %v2505_v32  ;;  %v4206_v40 = vpop.f32.mrb[83].mxu0  ;;  %v4212_v41 = vpop.f32.mrb[83].mxu1  ;;  %v4377_v23 = vld [vmem:[%s4947_s2 + $0x28] sm:$0xff]  }
 0x344   : > { %vm2508_vm15 = vcmp.ge.f32.partialorder %v2506_v38, 0.0  ;;  %v2509_v42 = vmul.f32 0.1, %v2506_v38  ;;  %vm2512_vm2 = vcmp.ge.f32.partialorder %v2507_v39, 0.0  ;;  %v2513_v43 = vmul.f32 0.1, %v2507_v39 }
 0x346   : > { %v2510_v44 = vsel %vm2508_vm15, %v2506_v38, %v2509_v42  ;;  %v2514_v45 = vsel %vm2512_vm2, %v2507_v39, %v2513_v43 }
 0x347   : > { %v2511_v47 = vpack.c.bf16 %v2510_v44, %v2510_v44  ;;  %v2515_v49 = vpack.c.bf16 %v2514_v45, %v2514_v45 }
 0x349   : > { %v2523_v50 = vrot.slane %v2515_v49, %v4459_v8  ;;  %4218 = vmatmul.mubr.msk.bf16.vlgmr.msra.gmra.mrb[84].mxu0 %vm910_vm7, %v2511_v47 }
 0x34a   : > { %4230 = vmatpush3.bf16.msra.mxu0 %v4376_v46  ;;  %4233 = vmatprep.mubr.msk.bf16.mxu0 %vm4402_vm0, %v4401_v2 }
 0x34b   : > { %v2525_v51 = vshrl.u32 %v2523_v50, 16  ;;  %4231 = vmatprep.subr.bf16.mxu0 %v4401_v2  ;;  %v2528_v53 = vshll.u32 %v2523_v50, 16 }
 0x34d   : > { %v2527_v52 = vrot.slane %v2525_v51, 7 }
 0x34e   : > { %4232 = vmatpush3.bf16.msra.mxu0 %v4377_v23 }
 0x34f   : > { %v2530_v55 = vor.u32 %v2528_v53, %v2527_v52  ;;  %4243 = vmatprep.subr.bf16.mxu0 %v4401_v2 }
 0x351   : > { %v2533_v57 = vsel %vm4569_vm10, %v2530_v55, %v2532_v56  ;;  %4234 = vmatmul.mubr.msk.bf16.vlgmr.msra.gmra.mrb[88].mxu0 %vm910_vm7, %v2515_v49 }
 0x352   : > { %2534 = vst [vmem:[#allocation2] sm:$0x3] %v2533_v57  ;;  %4244 = vmatpush3.bf16.msra.mxu0 %v4378_v54  ;;  %4245 = vmatprep.mubr.msk.bf16.mxu0 %vm4402_vm0, %v4401_v2 }
 0x353   : > { %4255 = vmatprep.subr.bf16.mxu0 %v4401_v2 }
 0x359   : > { %4246 = vmatmul.mubr.msk.bf16.vlgmr.msra.gmra.mrb[92].mxu0 %vm259_vm1, %v3760_v58  ;;  %v2535_v60 = vld [vmem:[#allocation2] sm:$0x1] }
 0x35a   : > { %4256 = vmatpush3.bf16.msra.mxu0 %v4378_v54  ;;  %4226 = vmatmul.mubr.msk.bf16.vlgmr.msra.gmra.mrb[84].mxu1 %vm910_vm7, %v2535_v60 }
 0x35b   : > { %4238 = vmatpush3.bf16.msra.mxu1 %v4381_v59  ;;  %4257 = vmatprep.mubr.msk.bf16.mxu0 %vm4402_vm0, %v4401_v2 }
 0x35c   : > { %4267 = vmatprep.subr.bf16.mxu0 %v4401_v2  ;;  %4239 = vmatprep.mubr.msk.bf16.mxu1 %vm4402_vm0, %v4401_v2 }
 0x35d   : > { %4249 = vmatprep.subr.bf16.mxu1 %v4401_v2 }
 0x361   : > { %4258 = vmatmul.mubr.msk.bf16.vlgmr.msra.gmra.mrb[96].mxu0 %vm259_vm1, %v3764_v61 }
 0x362   : > { %4268 = vmatpush3.bf16.msra.mxu0 %v4382_v62  ;;  %4240 = vmatmul.mubr.msk.bf16.vlgmr.msra.gmra.mrb[88].mxu1 %vm259_vm1, %v3761_v63 }
 0x363   : > { %4250 = vmatpush3.bf16.msra.mxu1 %v4381_v59  ;;  %4269 = vmatprep.mubr.msk.bf16.mxu0 %vm4402_vm0, %v4401_v2 }
 0x364   : > { %4279 = vmatprep.subr.bf16.mxu0 %v4401_v2  ;;  %4251 = vmatprep.mubr.msk.bf16.mxu1 %vm4402_vm0, %v4401_v2 }
 0x365   : > { %4261 = vmatprep.subr.bf16.mxu1 %v4401_v2 }
 0x369   : > { %4270 = vmatmul.mubr.msk.bf16.vlgmr.msra.gmra.mrb[100].mxu0 %vm259_vm1, %v3766_v0 }
 0x36a   : > { %4280 = vmatpush3.bf16.msra.mxu0 %v4383_v1  ;;  %4252 = vmatmul.mubr.msk.bf16.vlgmr.msra.gmra.mrb[92].mxu1 %vm259_vm1, %v3765_v3 }
 0x36b   : > { %4262 = vmatpush3.bf16.msra.mxu1 %v4382_v62  ;;  %4281 = vmatprep.mubr.msk.bf16.mxu0 %vm4402_vm0, %v4401_v2 }
 0x36c   : > { %4291 = vmatprep.subr.bf16.mxu0 %v4401_v2  ;;  %4263 = vmatprep.mubr.msk.bf16.mxu1 %vm4402_vm0, %v4401_v2 }
 0x36d   : > { %4273 = vmatprep.subr.bf16.mxu1 %v4401_v2 }
 0x371   : > { %4282 = vmatmul.mubr.msk.bf16.vlgmr.msra.gmra.mrb[104].mxu0 %vm259_vm1, %v3767_v6 }
 0x372   : > { %4292 = vmatpush3.bf16.msra.mxu0 %v4384_v7  ;;  %4264 = vmatmul.mubr.msk.bf16.vlgmr.msra.gmra.mrb[96].mxu1 %vm259_vm1, %v3762_v9 }
 0x373   : > { %4274 = vmatpush3.bf16.msra.mxu1 %v4383_v1  ;;  %4293 = vmatprep.mubr.msk.bf16.mxu0 %vm4402_vm0, %v4401_v2 }
 0x374   : > { %4303 = vmatprep.subr.bf16.mxu0 %v4401_v2  ;;  %4275 = vmatprep.mubr.msk.bf16.mxu1 %vm4402_vm0, %v4401_v2 }
 0x375   : > { %4285 = vmatprep.subr.bf16.mxu1 %v4401_v2 }
 0x379   : > { %4294 = vmatmul.mubr.msk.bf16.vlgmr.msra.gmra.mrb[108].mxu0 %vm259_vm1, %v3172_v13 }
 0x37a   : > { %4304 = vmatpush3.bf16.msra.mxu0 %v4385_v15  ;;  %4276 = vmatmul.mubr.msk.bf16.vlgmr.msra.gmra.mrb[100].mxu1 %vm259_vm1, %v3763_v16 }
 0x37b   : > { %4286 = vmatpush3.bf16.msra.mxu1 %v4384_v7  ;;  %4305 = vmatprep.mubr.msk.bf16.mxu0 %vm4402_vm0, %v4401_v2 }
 0x37c   : > { %4287 = vmatprep.mubr.msk.bf16.mxu1 %vm4402_vm0, %v4401_v2  ;;  %4297 = vmatprep.subr.bf16.mxu1 %v4401_v2 }
 0x37d   : > { %4317 = vmatprep.subr.bf16.mxu0 %v4401_v2 }
 0x381   : > { %4306 = vmatmul.mubr.msk.bf16.vlgmr.msra.gmra.mrb[112].mxu0 %vm259_vm1, %v3280_v19 }
 0x382   : > { %4288 = vmatmul.mubr.msk.bf16.vlgmr.msra.gmra.mrb[104].mxu1 %vm259_vm1, %v3764_v61  ;;  %4321 = vmatprep.mubr.msk.bf16.mxu0 %vm4402_vm0, %v4401_v2 }
 0x383   : > { %4298 = vmatpush3.bf16.msra.mxu1 %v4385_v15  ;;  %4299 = vmatprep.mubr.msk.bf16.mxu1 %vm4402_vm0, %v4401_v2 }
 0x384   : > { %4309 = vmatprep.subr.bf16.mxu1 %v4401_v2  ;;  %4318 = vmatpush3.bf16.msra.mxu0 %v4388_v22 }
 0x385   : > { %4319 = vmatprep.subr.bf16.mxu0 %v4401_v2 }
 0x388   : > { %4320 = vmatpush3.bf16.msra.mxu0 %v4390_v24 }
 0x38a   : > { %4300 = vmatmul.mubr.msk.bf16.vlgmr.msra.gmra.mrb[108].mxu1 %vm259_vm1, %v3765_v3 }
 0x38b   : > { %4313 = vmatprep.mubr.msk.bf16.mxu1 %vm4402_vm0, %v4401_v2  ;;  %4310 = vmatpush3.bf16.msra.mxu1 %v4386_v20 }
 0x38c   : > { %4311 = vmatprep.subr.bf16.mxu1 %v4401_v2 }
 0x38f   : > { %4312 = vmatpush3.bf16.msra.mxu1 %v4387_v21 }
 0x390   : > { %4325 = vmatprep.subr.bf16.mxu1 %v4401_v2 }
 0x41c   : > { %v2593_v25 = vpop.f32.mrb[84].mxu0 }
 0x41d   : > { %v4219_v26 = vpop.f32.mrb[85].mxu0 }
 0x41e   : > { %v2596_v27 = vpop.f32.mrb[86].mxu0 }
 0x41f   : > { %v4220_v28 = vpop.f32.mrb[87].mxu0 }
 0x424   : > { %v2707_v29 = vpop.f32.mrb[88].mxu0 }
 0x425   : > { %v4235_v30 = vpop.f32.mrb[89].mxu0 }
 0x426   : > { %v2710_v31 = vpop.f32.mrb[90].mxu0 }
 0x427   : > { %v4236_v32 = vpop.f32.mrb[91].mxu0 }
 0x428   : > { %v4392_v32 = vld [vmem:[%s4948_s3] ss:$0 sm:$0xff] }
 0x42c   : > { %v2825_v33 = vpop.f32.mrb[92].mxu0 }
 0x42d   : > { %v2648_v35 = vpop.f32.mrb[84].mxu1  ;;  %v4247_v36 = vpop.f32.mrb[93].mxu0 }
 0x42e   : > { %v2649_v37 = vadd.f32 %v2648_v35, %v2593_v25  ;;  %v4227_v38 = vpop.f32.mrb[85].mxu1  ;;  %v2828_v39 = vpop.f32.mrb[94].mxu0 }
 0x42f   : > { %v2651_v40 = vpop.f32.mrb[86].mxu1  ;;  %v4248_v41 = vpop.f32.mrb[95].mxu0 }
 0x430   : > { %v2713_v42 = vadd.f32 %v2707_v29, %v2649_v37  ;;  %v4228_v43 = vpop.f32.mrb[87].mxu1 }
 0x432   : > { %v2714_v44 = vadd.f32 %v4677_v34, %v2713_v42 }
 0x434   : > { %vm2715_vm1 = vcmp.ge.f32.partialorder %v2714_v44, 0.0  ;;  %v2716_v45 = vmul.f32 0.1, %v2714_v44  ;;  %v2911_v46 = vpop.f32.mrb[96].mxu0 }
 0x435   : > { %v2776_v47 = vpop.f32.mrb[88].mxu1  ;;  %v4259_v49 = vpop.f32.mrb[97].mxu0 }
 0x436   : > { %v2717_v50 = vsel %vm2715_vm1, %v2714_v44, %v2716_v45  ;;  %v2826_v23 = vadd.f32 %v2825_v33, %v2776_v47  ;;  %v4241_v51 = vpop.f32.mrb[89].mxu1  ;;  %v2914_v52 = vpop.f32.mrb[98].mxu0 }
 0x437   : > { %3759 = vst.msk [vmem:[%s4684_s7 + $0x4] sm:$0x3] %vm882_vm8, %v2717_v50  ;;  %v2779_v53 = vpop.f32.mrb[90].mxu1  ;;  %v4260_v54 = vpop.f32.mrb[99].mxu0 }
 0x438   : > { %v4242_v55 = vpop.f32.mrb[91].mxu1  ;;  %v4389_v54 = vld [vmem:[%s4947_s2 + $0x20] sm:$0xff]  }
 0x439   : > { %v3351_v55 = vld [vmem:[#allocation2] sm:$0x3] }
 0x43c   : > { %v3006_v56 = vpop.f32.mrb[100].mxu0 }
 0x43d   : > { %v2868_v57 = vpop.f32.mrb[92].mxu1  ;;  %v4271_v58 = vpop.f32.mrb[101].mxu0 }
 0x43e   : > { %v2912_v59 = vadd.f32 %v2911_v46, %v2868_v57  ;;  %v4253_v60 = vpop.f32.mrb[93].mxu1  ;;  %v3009_v61 = vpop.f32.mrb[102].mxu0  ;;  %v4391_v57 = vld [vmem:[%s4947_s2 + $0x28] sm:$0xff]  }
 0x43f   : > { %v2871_v62 = vpop.f32.mrb[94].mxu1  ;;  %v4272_v63 = vpop.f32.mrb[103].mxu0 }
 0x440   : > { %v4254_v0 = vpop.f32.mrb[95].mxu1  ;;  %v3012_v1 = vadd.f32 %v3006_v56, %v2912_v59 }
 0x444   : > { %v3102_v3 = vpop.f32.mrb[104].mxu0 }
 0x445   : > { %v3108_v4 = vadd.f32 %v3102_v3, %v3012_v1  ;;  %v2962_v5 = vpop.f32.mrb[96].mxu1  ;;  %v4283_v6 = vpop.f32.mrb[105].mxu0 }
 0x446   : > { %v2968_v7 = vadd.f32 %v2962_v5, %v2826_v23  ;;  %v4265_v9 = vpop.f32.mrb[97].mxu1  ;;  %v3105_v10 = vpop.f32.mrb[106].mxu0 }
 0x447   : > { %v2965_v11 = vpop.f32.mrb[98].mxu1  ;;  %v4284_v12 = vpop.f32.mrb[107].mxu0 }
 0x448   : > { %v4266_v13 = vpop.f32.mrb[99].mxu1 }
 0x44c   : > { %v3210_v14 = vpop.f32.mrb[108].mxu0 }
 0x44d   : > { %v3216_v15 = vadd.f32 %v3210_v14, %v3108_v4  ;;  %v3058_v16 = vpop.f32.mrb[100].mxu1  ;;  %v4295_v17 = vpop.f32.mrb[109].mxu0 }
 0x44e   : > { %v3064_v18 = vadd.f32 %v3058_v16, %v2968_v7  ;;  %v4277_v19 = vpop.f32.mrb[101].mxu1  ;;  %v3213_v20 = vpop.f32.mrb[110].mxu0 }
 0x44f   : > { %v3061_v21 = vpop.f32.mrb[102].mxu1  ;;  %v4296_v22 = vpop.f32.mrb[111].mxu0 }
 0x450   : > { %v4278_v24 = vpop.f32.mrb[103].mxu1 }
 0x454   : > { %v3318_v25 = vpop.f32.mrb[112].mxu0 }
 0x455   : > { %v3324_v26 = vadd.f32 %v3318_v25, %v3216_v15  ;;  %v3151_v27 = vpop.f32.mrb[104].mxu1  ;;  %v4307_v28 = vpop.f32.mrb[113].mxu0 }
 0x456   : > { %v3157_v29 = vadd.f32 %v3151_v27, %v3064_v18  ;;  %v4289_v30 = vpop.f32.mrb[105].mxu1  ;;  %v3321_v31 = vpop.f32.mrb[114].mxu0 }
 0x457   : > { %v3326_v33 = vadd.f32 %v4392_v32, %v3324_v26  ;;  %v3154_v35 = vpop.f32.mrb[106].mxu1  ;;  %v4308_v36 = vpop.f32.mrb[115].mxu0 }
 0x458   : > { %v4290_v37 = vpop.f32.mrb[107].mxu1 }
 0x459   : > { %vm3331_vm3 = vcmp.ge.f32.partialorder %v3326_v33, 0.0  ;;  %v3332_v38 = vmul.f32 0.1, %v3326_v33 }
 0x45b   : > { %v3333_v39 = vsel %vm3331_vm3, %v3326_v33, %v3332_v38 }
 0x45c   : > { %v3334_v40 = vpack.c.bf16 %v3333_v39, %v3333_v39 }
 0x45d   : > { %v3259_v41 = vpop.f32.mrb[108].mxu1 }
 0x45e   : > { %v3342_v42 = vrot.slane %v3334_v40, %v4459_v8  ;;  %v3265_v43 = vadd.f32 %v3259_v41, %v3157_v29  ;;  %v4301_v44 = vpop.f32.mrb[109].mxu1 }
 0x45f   : > { %v3262_v45 = vpop.f32.mrb[110].mxu1 }
 0x460   : > { %v3344_v46 = vshrl.u32 %v3342_v42, 16  ;;  %v3325_v47 = vadd.f32 %v4392_v32, %v3265_v43  ;;  %v4302_v49 = vpop.f32.mrb[111].mxu1  ;;  %v3347_v23 = vshll.u32 %v3342_v42, 16 }
 0x462   : > { %v3346_v50 = vrot.slane %v3344_v46, 7  ;;  %vm3327_vm4 = vcmp.ge.f32.partialorder %v3325_v47, 0.0  ;;  %v3328_v51 = vmul.f32 0.1, %v3325_v47 }
 0x464   : > { %v3349_v52 = vor.u32 %v3347_v23, %v3346_v50  ;;  %v3329_v53 = vsel %vm3327_vm4, %v3325_v47, %v3328_v51 }
 0x465   : > { %v3330_v56 = vpack.c.bf16 %v3329_v53, %v3329_v53 }
 0x466   : > { %v3352_v8 = vsel %vm4569_vm10, %v3349_v52, %v3351_v55 }
 0x467   : > { %3353 = vst [vmem:[#allocation2] sm:$0x3] %v3352_v8  ;;  %4314 = vmatmul.mubr.msk.bf16.vlgmr.msra.gmra.mrb[112].mxu1 %vm910_vm7, %v3330_v56 }
 0x468   : > { %4326 = vmatpush3.bf16.msra.mxu1 %v4389_v54  ;;  %4329 = vmatprep.mubr.msk.bf16.mxu1 %vm4402_vm0, %v4401_v2 }
 0x469   : > { %4327 = vmatprep.subr.bf16.mxu1 %v4401_v2 }
 0x46c   : > { %4328 = vmatpush3.bf16.msra.mxu1 %v4391_v57 }
 0x46e   : > { %v3354_v58 = vld [vmem:[#allocation2] sm:$0x1] }
 0x46f   : > { %4322 = vmatmul.mubr.msk.bf16.vlgmr.msra.gmra.mrb[116].mxu0 %vm910_vm7, %v3354_v58  ;;  %4330 = vmatmul.mubr.msk.bf16.vlgmr.msra.gmra.mrb[116].mxu1 %vm910_vm7, %v3334_v40 }
 0x53a   : > { %v3412_v48 = vpop.f32.mrb[112].mxu1 }
 0x53b   : > { %v4315_v59 = vpop.f32.mrb[113].mxu1 }
 0x53c   : > { %v3415_v60 = vpop.f32.mrb[114].mxu1 }
 0x53d   : > { %v4316_v61 = vpop.f32.mrb[115].mxu1 }
 0x542   : > { %v3467_v62 = vpop.f32.mrb[116].mxu0  ;;  %v3526_v63 = vpop.f32.mrb[116].mxu1 }
 0x543   : > { %v3468_v0 = vadd.f32 %v3467_v62, %v3412_v48  ;;  %v4323_v1 = vpop.f32.mrb[117].mxu0  ;;  %v4331_v3 = vpop.f32.mrb[117].mxu1 }
 0x544   : > { %v3470_v4 = vpop.f32.mrb[118].mxu0  ;;  %v3529_v5 = vpop.f32.mrb[118].mxu1 }
 0x545   : > { %v3532_v6 = vadd.f32 %v3526_v63, %v3468_v0  ;;  %v4324_v2 = vpop.f32.mrb[119].mxu0  ;;  %v4332_v7 = vpop.f32.mrb[119].mxu1 }
 0x547   : > { %v3533_v9 = vadd.f32 %v4677_v34, %v3532_v6 }
 0x549   : > { %vm3534_vm0 = vcmp.ge.f32.partialorder %v3533_v9, 0.0  ;;  %v3535_v10 = vmul.f32 0.1, %v3533_v9 }
 0x54b   : > { %v3536_v11 = vsel %vm3534_vm0, %v3533_v9, %v3535_v10 }
 0x54c   : > { %3813 = vst.msk [vmem:[%s4684_s7 + $0x6] sm:$0x3] %vm882_vm8, %v3536_v11 }
 0x54d PF: > { %s15_s18 = sadd.s32 1, %s4399_s18  }
 0x54e   : > { %p12_p4 = scmp.ge.s32.totalorder %s15_s18, 4  }
 0x550   :  { %14 = sbr.rel (!%p12_p4) target bundleno = 1 (0x1), region = 83 }

</bundles_post_ra>
